<compile_context>
chip_gen: v5e
topology: v5e:2x2
jax: 0.10.0
libtpu: 0.0.40
codegen_flags: <defaults>
</compile_context>

<pallas_src>
import jax
import jax.numpy as jnp
from jax.experimental import pallas as pl
from jax.experimental.pallas import tpu as pltpu


# --------------------------------------------------------------------------
# Kernel
# --------------------------------------------------------------------------
def vae_kernel(
    # per-batch-tile inputs
    x_ref, eps_ref,
    # encoder params (wmv/bmv = fused [mean | logvar] projection)
    w1_ref, b1_ref, w2_ref, b2_ref, wmv_ref, bmv_ref,
    # decoder params
    wd1_ref, bd1_ref, wd2_ref, bd2_ref, wo_ref, bo_ref,
    # per-batch-tile outputs
    recon_ref, meanvar_ref,
):
    bf16 = jnp.bfloat16
    f32 = jnp.float32
    latent = eps_ref.shape[-1]

    x = x_ref[...].astype(bf16)  # already bf16 from the wrapper (no-op cast)

    # ---------------- Encoder ----------------
    h1 = jnp.maximum(
        jnp.dot(x, w1_ref[...], preferred_element_type=f32) + b1_ref[...], 0.0)
    h2 = jnp.maximum(
        jnp.dot(h1.astype(bf16), w2_ref[...], preferred_element_type=f32)
        + b2_ref[...], 0.0)
    # Fused mean|logvar projection: one lane-dense (tile, 2*latent) result.
    meanvar = (jnp.dot(h2.astype(bf16), wmv_ref[...], preferred_element_type=f32)
               + bmv_ref[...])
    z_mean = meanvar[:, :latent]
    z_logvar = meanvar[:, latent:]

    # ---------------- Reparameterize ----------------
    z = eps_ref[...] * jnp.exp(0.5 * z_logvar) + z_mean

    # ---------------- Decoder ----------------
    d1 = jnp.maximum(
        jnp.dot(z.astype(bf16), wd1_ref[...], preferred_element_type=f32)
        + bd1_ref[...], 0.0)
    d2 = jnp.maximum(
        jnp.dot(d1.astype(bf16), wd2_ref[...], preferred_element_type=f32)
        + bd2_ref[...], 0.0)
    logits = (jnp.dot(d2.astype(bf16), wo_ref[...], preferred_element_type=f32)
              + bo_ref[...])

    recon_ref[...] = jax.nn.sigmoid(logits).astype(recon_ref.dtype)
    meanvar_ref[...] = meanvar.astype(meanvar_ref.dtype)


# --------------------------------------------------------------------------
# Chip introspection + batch-tile selection
# --------------------------------------------------------------------------
def _chip_info():
    """(num_tensorcores_sharing_grid, vmem_capacity_bytes, is_v5e)."""
    kind = ""
    try:
        kind = jax.devices()[0].device_kind.lower()
    except Exception:
        pass
    is_v7 = "7" in kind
    is_v5e = ("v5e" in kind) or ("v5" in kind and "lite" in kind)
    # Chips whose TensorCores share a grid via "parallel" dimension_semantics.
    num_tc = 2 if (is_v7 or "v4" in kind or "v5p" in kind) else 1
    try:
        vmem_cap = int(pltpu.get_tpu_info().vmem_capacity_bytes)
    except Exception:
        vmem_cap = (64 << 20) if is_v7 else (128 << 20)
    return num_tc, vmem_cap, is_v5e


def _pick_batch_tile(B, input_dim_p, latent_dim, param_bytes,
                     num_tc, vmem_cap, is_v5e):
    """Largest sublane-friendly tile that fits VMEM and keeps all TCs busy."""
    # Per-row bytes of the double-buffered streamed tensors:
    #   x (bf16) + eps (f32) + recon (bf16) + meanvar (f32)
    per_row = 2 * (input_dim_p * 2 + latent_dim * 4
                   + input_dim_p * 2 + 2 * latent_dim * 4)
    avail = vmem_cap - param_bytes - (8 << 20)
    max_rows = max(8, avail // max(per_row, 1)) if avail > 0 else 8

    cap = 512
    if is_v5e and input_dim_p >= 4096:
        cap = 256  # smaller MXU / scoped-VMEM budget on v5e

    # Minimum number of grid steps we want.
    want_steps = 1
    if num_tc > 1 and B >= 32:
        want_steps = num_tc                    # keep the 2nd TensorCore busy (v7x)
    if input_dim_p >= 2048:
        want_steps = max(want_steps, 2)        # DMA/compute overlap for big tiles

    cand_set = {t for t in range(8, min(B, cap) + 1, 8) if B % t == 0}
    if B <= cap:
        cand_set.add(B)                        # whole batch is always a candidate
    if not cand_set:
        return B                               # ragged small batch: one tile
    cands = sorted(cand_set, reverse=True)

    def ok(t, steps_needed):
        return t <= max_rows and (B // t) >= steps_needed

    for steps in (want_steps, 1):
        for prefer16 in (True, False):         # prefer bf16 sublane-packed tiles
            for t in cands:
                if prefer16 and t % 16 != 0:
                    continue
                if ok(t, steps):
                    return t
    return min(cands)


# --------------------------------------------------------------------------
# Wrapper
# --------------------------------------------------------------------------
def vae_forward(x, eps, params, *, batch_tile=None, recon_dtype=jnp.bfloat16):
    """Fused VAE forward. Returns (reconstructed, z_mean, z_logvar).

    The kernel streams x / recon in bf16; pass recon_dtype=jnp.float32 if a
    full-precision reconstruction is required by the caller.
    """
    B, input_dim = x.shape
    latent_dim = params["wm"].shape[1]
    assert eps.shape == (B, latent_dim)

    bf16 = jnp.bfloat16
    f32 = jnp.float32
    num_tc, vmem_cap, is_v5e = _chip_info()

    # Lane-align the feature dim so the recon store is unmasked (vst).
    pad = (-input_dim) % 128
    input_dim_p = input_dim + pad

    x_p = x.astype(bf16)
    w1 = params["w1"].astype(bf16)
    wo = params["wo"].astype(bf16)
    bo = params["bo"].astype(f32)
    if pad:
        x_p = jnp.pad(x_p, ((0, 0), (0, pad)))
        w1 = jnp.pad(w1, ((0, pad), (0, 0)))
        wo = jnp.pad(wo, ((0, 0), (0, pad)))
        bo = jnp.pad(bo, ((0, 0), (0, pad)))

    # Pack mean/logvar projections into one lane-dense (64, 2*latent) weight.
    wmv = jnp.concatenate([params["wm"], params["wv"]], axis=1).astype(bf16)
    bmv = jnp.concatenate([params["bm"], params["bv"]], axis=1).astype(f32)

    param_arrays = [
        w1, params["b1"].astype(f32),
        params["w2"].astype(bf16), params["b2"].astype(f32),
        wmv, bmv,
        params["wd1"].astype(bf16), params["bd1"].astype(f32),
        params["wd2"].astype(bf16), params["bd2"].astype(f32),
        wo, bo,
    ]
    param_bytes = sum(int(p.size) * p.dtype.itemsize for p in param_arrays)

    if batch_tile is None:
        batch_tile = _pick_batch_tile(B, input_dim_p, latent_dim, param_bytes,
                                      num_tc, vmem_cap, is_v5e)
    assert B % batch_tile == 0, "batch must be divisible by batch_tile"
    grid = (B // batch_tile,)

    # Double-buffered streamed bytes per tile (x bf16, eps f32, recon bf16,
    # meanvar f32).
    tile_io_bytes = 2 * batch_tile * (input_dim_p * 2 + latent_dim * 4
                                      + input_dim_p * 2 + 2 * latent_dim * 4)

    out_shape = (
        jax.ShapeDtypeStruct((B, input_dim_p), bf16),        # recon (padded)
        jax.ShapeDtypeStruct((B, 2 * latent_dim), f32),       # mean | logvar
    )

    def build(buffered_params):
        # Weights/biases never change across grid steps (constant index_map);
        # Buffered(1) avoids a dead second VMEM copy of each parameter.
        pm = {}
        if buffered_params and hasattr(pl, "Buffered"):
            pm = {"pipeline_mode": pl.Buffered(1)}
        param_specs = [pl.BlockSpec(p.shape, lambda i: (0, 0), **pm)
                       for p in param_arrays]

        in_specs = [
            pl.BlockSpec((batch_tile, input_dim_p), lambda i: (i, 0)),   # x
            pl.BlockSpec((batch_tile, latent_dim), lambda i: (i, 0)),    # eps
        ] + param_specs

        out_specs = [
            pl.BlockSpec((batch_tile, input_dim_p), lambda i: (i, 0)),       # recon
            pl.BlockSpec((batch_tile, 2 * latent_dim), lambda i: (i, 0)),    # mean|logvar
        ]

        param_buf = 1 if pm else 2
        vmem_limit = int(1.25 * (param_bytes * param_buf + tile_io_bytes)) + (8 << 20)
        vmem_limit = max(vmem_limit, 32 << 20)
        vmem_limit = min(vmem_limit, int(vmem_cap * 0.9))

        return pl.pallas_call(
            vae_kernel,
            out_shape=out_shape,
            grid_spec=pltpu.PrefetchScalarGridSpec(
                num_scalar_prefetch=0,
                grid=grid,
                in_specs=in_specs,
                out_specs=out_specs,
            ),
            compiler_params=pltpu.CompilerParams(
                dimension_semantics=("parallel",),
                vmem_limit_bytes=vmem_limit,
            ),
        )

    args = (x_p, eps, *param_arrays)
    try:
        recon_p, meanvar = build(buffered_params=True)(*args)
    except Exception:
        # Fallback for jax versions where pipeline_mode / Buffered(1) on a
        # constant-index BlockSpec is not supported.
        recon_p, meanvar = build(buffered_params=False)(*args)

    recon = recon_p[:, :input_dim] if pad else recon_p
    if recon_dtype is not None and recon.dtype != jnp.dtype(recon_dtype):
        recon = recon.astype(recon_dtype)
    z_mean = meanvar[:, :latent_dim]
    z_logvar = meanvar[:, latent_dim:]
    return recon, z_mean, z_logvar


# --------------------------------------------------------------------------
# Parameters + pure-JAX references
# --------------------------------------------------------------------------
def init_params(key, input_dim, latent_dim):
    """f32 params matching the nn.Linear shapes (weights stored as (in, out))."""
    def linear(key, fan_in, fan_out):
        kw, kb = jax.random.split(key)
        bound = 1.0 / jnp.sqrt(fan_in)
        w = jax.random.uniform(kw, (fan_in, fan_out), jnp.float32, -bound, bound)
        b = jax.random.uniform(kb, (1, fan_out), jnp.float32, -bound, bound)
        return w, b

    keys = jax.random.split(key, 7)
    # Encoder: input_dim -> 128 -> 64 -> (latent, latent)
    w1, b1 = linear(keys[0], input_dim, 128)
    w2, b2 = linear(keys[1], 128, 64)
    wm, bm = linear(keys[2], 64, latent_dim)
    wv, bv = linear(keys[3], 64, latent_dim)
    # Decoder: latent -> 64 -> 128 -> input_dim
    wd1, bd1 = linear(keys[4], latent_dim, 64)
    wd2, bd2 = linear(keys[5], 64, 128)
    wo, bo = linear(keys[6], 128, input_dim)
    return dict(w1=w1, b1=b1, w2=w2, b2=b2, wm=wm, bm=bm, wv=wv, bv=bv,
                wd1=wd1, bd1=bd1, wd2=wd2, bd2=bd2, wo=wo, bo=bo)


def _dot_bf16(a, w):
    return jnp.dot(a.astype(jnp.bfloat16), w.astype(jnp.bfloat16),
                   preferred_element_type=jnp.float32)


def vae_forward_ref_bf16(x, eps, p):
    """Pure-JAX reference mirroring the kernel's bf16-operand matmuls."""
    h1 = jnp.maximum(_dot_bf16(x, p["w1"]) + p["b1"], 0.0)
    h2 = jnp.maximum(_dot_bf16(h1, p["w2"]) + p["b2"], 0.0)
    z_mean = _dot_bf16(h2, p["wm"]) + p["bm"]
    z_logvar = _dot_bf16(h2, p["wv"]) + p["bv"]
    z = eps * jnp.exp(0.5 * z_logvar) + z_mean
    d1 = jnp.maximum(_dot_bf16(z, p["wd1"]) + p["bd1"], 0.0)
    d2 = jnp.maximum(_dot_bf16(d1, p["wd2"]) + p["bd2"], 0.0)
    recon = jax.nn.sigmoid(_dot_bf16(d2, p["wo"]) + p["bo"])
    return recon, z_mean, z_logvar


def vae_forward_ref_f32(x, eps, p):
    """Full-precision reference (semantic sanity check)."""
    h1 = jnp.maximum(x @ p["w1"] + p["b1"], 0.0)
    h2 = jnp.maximum(h1 @ p["w2"] + p["b2"], 0.0)
    z_mean = h2 @ p["wm"] + p["bm"]
    z_logvar = h2 @ p["wv"] + p["bv"]
    z = eps * jnp.exp(0.5 * z_logvar) + z_mean
    d1 = jnp.maximum(z @ p["wd1"] + p["bd1"], 0.0)
    d2 = jnp.maximum(d1 @ p["wd2"] + p["bd2"], 0.0)
    recon = jax.nn.sigmoid(d2 @ p["wo"] + p["bo"])
    return recon, z_mean, z_logvar


if __name__ == "__main__":
    B = 16
    input_dim = 256   # small stand-in for the TSV gene-expression feature count
    latent_dim = 64

    key = jax.random.PRNGKey(0)
    k_x, k_eps, k_params = jax.random.split(key, 3)

    x = jax.random.uniform(k_x, (B, input_dim), jnp.float32)      # data in [0,1]
    eps = jax.random.normal(k_eps, (B, latent_dim), jnp.float32)  # reparam noise
    params = init_params(k_params, input_dim, latent_dim)

    recon, z_mean, z_logvar = jax.block_until_ready(
        vae_forward(x, eps, params))
    recon_f32 = recon.astype(jnp.float32)

    # correctness vs bf16-mirroring reference (tight) and f32 reference (loose)
    rb, mb, lvb = vae_forward_ref_bf16(x, eps, params)
    assert jnp.allclose(recon_f32, rb, atol=1e-2, rtol=1e-2)
    assert jnp.allclose(z_mean, mb, atol=1e-2, rtol=1e-2)
    assert jnp.allclose(z_logvar, lvb, atol=1e-2, rtol=1e-2)

    rf, mf, lvf = vae_forward_ref_f32(x, eps, params)
    assert jnp.allclose(recon_f32, rf, atol=5e-2, rtol=5e-2)
    assert jnp.allclose(z_mean, mf, atol=5e-2, rtol=5e-2)
    assert jnp.allclose(z_logvar, lvf, atol=5e-2, rtol=5e-2)

    print("KERNEL_OK")
</pallas_src>

<mosaic_0001>
module attributes {stable_mosaic.version = 11 : i64} {
  func.func @vae_kernel(%arg0: i32, %arg1: memref<16x256xbf16, #tpu.memory_space<vmem>>, %arg2: memref<16x64xf32, #tpu.memory_space<vmem>>, %arg3: memref<256x128xbf16, #tpu.memory_space<vmem>>, %arg4: memref<1x128xf32, #tpu.memory_space<vmem>>, %arg5: memref<128x64xbf16, #tpu.memory_space<vmem>>, %arg6: memref<1x64xf32, #tpu.memory_space<vmem>>, %arg7: memref<64x128xbf16, #tpu.memory_space<vmem>>, %arg8: memref<1x128xf32, #tpu.memory_space<vmem>>, %arg9: memref<64x64xbf16, #tpu.memory_space<vmem>>, %arg10: memref<1x64xf32, #tpu.memory_space<vmem>>, %arg11: memref<64x128xbf16, #tpu.memory_space<vmem>>, %arg12: memref<1x128xf32, #tpu.memory_space<vmem>>, %arg13: memref<128x256xbf16, #tpu.memory_space<vmem>>, %arg14: memref<1x256xf32, #tpu.memory_space<vmem>>, %arg15: memref<16x256xbf16, #tpu.memory_space<vmem>>, %arg16: memref<16x128xf32, #tpu.memory_space<vmem>>) attributes {dimension_semantics = [#tpu.dimension_semantics<parallel>], iteration_bounds = array<i64: 1>, scalar_prefetch = 0 : i64, scratch_operands = 0 : i64, tpu.core_type = #tpu.core_type<tc>, window_params = [{transform_indices = @transform_0, window_bounds = array<i64: 16, 256>}, {transform_indices = @transform_1, window_bounds = array<i64: 16, 64>}, {pipeline_mode = #tpu.pipeline_mode<synchronous>, transform_indices = @transform_2, window_bounds = array<i64: 256, 128>}, {pipeline_mode = #tpu.pipeline_mode<synchronous>, transform_indices = @transform_3, window_bounds = array<i64: 1, 128>}, {pipeline_mode = #tpu.pipeline_mode<synchronous>, transform_indices = @transform_4, window_bounds = array<i64: 128, 64>}, {pipeline_mode = #tpu.pipeline_mode<synchronous>, transform_indices = @transform_5, window_bounds = array<i64: 1, 64>}, {pipeline_mode = #tpu.pipeline_mode<synchronous>, transform_indices = @transform_6, window_bounds = array<i64: 64, 128>}, {pipeline_mode = #tpu.pipeline_mode<synchronous>, transform_indices = @transform_7, window_bounds = array<i64: 1, 128>}, {pipeline_mode = #tpu.pipeline_mode<synchronous>, transform_indices = @transform_8, window_bounds = array<i64: 64, 64>}, {pipeline_mode = #tpu.pipeline_mode<synchronous>, transform_indices = @transform_9, window_bounds = array<i64: 1, 64>}, {pipeline_mode = #tpu.pipeline_mode<synchronous>, transform_indices = @transform_10, window_bounds = array<i64: 64, 128>}, {pipeline_mode = #tpu.pipeline_mode<synchronous>, transform_indices = @transform_11, window_bounds = array<i64: 1, 128>}, {pipeline_mode = #tpu.pipeline_mode<synchronous>, transform_indices = @transform_12, window_bounds = array<i64: 128, 256>}, {pipeline_mode = #tpu.pipeline_mode<synchronous>, transform_indices = @transform_13, window_bounds = array<i64: 1, 256>}, {transform_indices = @transform_14, window_bounds = array<i64: 16, 256>}, {transform_indices = @transform_15, window_bounds = array<i64: 16, 128>}]} {
    %c0 = arith.constant 0 : index
    %c0_0 = arith.constant 0 : index
    %0 = vector.load %arg1[%c0, %c0_0] : memref<16x256xbf16, #tpu.memory_space<vmem>>, vector<16x256xbf16>
    %c0_1 = arith.constant 0 : index
    %c0_2 = arith.constant 0 : index
    %1 = vector.load %arg3[%c0_1, %c0_2] : memref<256x128xbf16, #tpu.memory_space<vmem>>, vector<256x128xbf16>
    %cst = arith.constant dense<0.000000e+00> : vector<16x128xf32>
    %2 = tpu.matmul %0, %1, %cst {dimension_numbers = #tpu.dot_dimension_numbers<[1], [0], [0], [1], [0, 0, 1, 1], [], []>} : vector<16x256xbf16>, vector<256x128xbf16>, vector<16x128xf32> -> vector<16x128xf32>
    %c0_3 = arith.constant 0 : index
    %c0_4 = arith.constant 0 : index
    %3 = vector.load %arg4[%c0_3, %c0_4] : memref<1x128xf32, #tpu.memory_space<vmem>>, vector<1x128xf32>
    %4 = vector.broadcast %3 : vector<1x128xf32> to vector<16x128xf32>
    %5 = arith.addf %2, %4 : vector<16x128xf32>
    %cst_5 = arith.constant 0.000000e+00 : f32
    %6 = vector.broadcast %cst_5 : f32 to vector<16x128xf32>
    %7 = arith.maximumf %5, %6 : vector<16x128xf32>
    %8 = arith.truncf %7 : vector<16x128xf32> to vector<16x128xbf16>
    %c0_6 = arith.constant 0 : index
    %c0_7 = arith.constant 0 : index
    %9 = vector.load %arg5[%c0_6, %c0_7] : memref<128x64xbf16, #tpu.memory_space<vmem>>, vector<128x64xbf16>
    %cst_8 = arith.constant dense<0.000000e+00> : vector<16x64xf32>
    %10 = tpu.matmul %8, %9, %cst_8 {dimension_numbers = #tpu.dot_dimension_numbers<[1], [0], [0], [1], [0, 0, 1, 1], [], []>} : vector<16x128xbf16>, vector<128x64xbf16>, vector<16x64xf32> -> vector<16x64xf32>
    %c0_9 = arith.constant 0 : index
    %c0_10 = arith.constant 0 : index
    %11 = vector.load %arg6[%c0_9, %c0_10] : memref<1x64xf32, #tpu.memory_space<vmem>>, vector<1x64xf32>
    %12 = vector.broadcast %11 : vector<1x64xf32> to vector<16x64xf32>
    %13 = arith.addf %10, %12 : vector<16x64xf32>
    %cst_11 = arith.constant 0.000000e+00 : f32
    %14 = vector.broadcast %cst_11 : f32 to vector<16x64xf32>
    %15 = arith.maximumf %13, %14 : vector<16x64xf32>
    %16 = arith.truncf %15 : vector<16x64xf32> to vector<16x64xbf16>
    %c0_12 = arith.constant 0 : index
    %c0_13 = arith.constant 0 : index
    %17 = vector.load %arg7[%c0_12, %c0_13] : memref<64x128xbf16, #tpu.memory_space<vmem>>, vector<64x128xbf16>
    %cst_14 = arith.constant dense<0.000000e+00> : vector<16x128xf32>
    %18 = tpu.matmul %16, %17, %cst_14 {dimension_numbers = #tpu.dot_dimension_numbers<[1], [0], [0], [1], [0, 0, 1, 1], [], []>} : vector<16x64xbf16>, vector<64x128xbf16>, vector<16x128xf32> -> vector<16x128xf32>
    %c0_15 = arith.constant 0 : index
    %c0_16 = arith.constant 0 : index
    %19 = vector.load %arg8[%c0_15, %c0_16] : memref<1x128xf32, #tpu.memory_space<vmem>>, vector<1x128xf32>
    %20 = vector.broadcast %19 : vector<1x128xf32> to vector<16x128xf32>
    %21 = arith.addf %18, %20 : vector<16x128xf32>
    %22 = vector.extract_strided_slice %21 {offsets = [0, 0], sizes = [16, 64], strides = [1, 1]} : vector<16x128xf32> to vector<16x64xf32>
    %23 = vector.extract_strided_slice %21 {offsets = [0, 64], sizes = [16, 64], strides = [1, 1]} : vector<16x128xf32> to vector<16x64xf32>
    %c0_17 = arith.constant 0 : index
    %c0_18 = arith.constant 0 : index
    %24 = vector.load %arg2[%c0_17, %c0_18] : memref<16x64xf32, #tpu.memory_space<vmem>>, vector<16x64xf32>
    %cst_19 = arith.constant 5.000000e-01 : f32
    %25 = vector.broadcast %cst_19 : f32 to vector<16x64xf32>
    %26 = arith.mulf %25, %23 : vector<16x64xf32>
    %27 = math.exp %26 : vector<16x64xf32>
    %28 = arith.mulf %24, %27 : vector<16x64xf32>
    %29 = arith.addf %28, %22 : vector<16x64xf32>
    %30 = arith.truncf %29 : vector<16x64xf32> to vector<16x64xbf16>
    %c0_20 = arith.constant 0 : index
    %c0_21 = arith.constant 0 : index
    %31 = vector.load %arg9[%c0_20, %c0_21] : memref<64x64xbf16, #tpu.memory_space<vmem>>, vector<64x64xbf16>
    %cst_22 = arith.constant dense<0.000000e+00> : vector<16x64xf32>
    %32 = tpu.matmul %30, %31, %cst_22 {dimension_numbers = #tpu.dot_dimension_numbers<[1], [0], [0], [1], [0, 0, 1, 1], [], []>} : vector<16x64xbf16>, vector<64x64xbf16>, vector<16x64xf32> -> vector<16x64xf32>
    %c0_23 = arith.constant 0 : index
    %c0_24 = arith.constant 0 : index
    %33 = vector.load %arg10[%c0_23, %c0_24] : memref<1x64xf32, #tpu.memory_space<vmem>>, vector<1x64xf32>
    %34 = vector.broadcast %33 : vector<1x64xf32> to vector<16x64xf32>
    %35 = arith.addf %32, %34 : vector<16x64xf32>
    %cst_25 = arith.constant 0.000000e+00 : f32
    %36 = vector.broadcast %cst_25 : f32 to vector<16x64xf32>
    %37 = arith.maximumf %35, %36 : vector<16x64xf32>
    %38 = arith.truncf %37 : vector<16x64xf32> to vector<16x64xbf16>
    %c0_26 = arith.constant 0 : index
    %c0_27 = arith.constant 0 : index
    %39 = vector.load %arg11[%c0_26, %c0_27] : memref<64x128xbf16, #tpu.memory_space<vmem>>, vector<64x128xbf16>
    %cst_28 = arith.constant dense<0.000000e+00> : vector<16x128xf32>
    %40 = tpu.matmul %38, %39, %cst_28 {dimension_numbers = #tpu.dot_dimension_numbers<[1], [0], [0], [1], [0, 0, 1, 1], [], []>} : vector<16x64xbf16>, vector<64x128xbf16>, vector<16x128xf32> -> vector<16x128xf32>
    %c0_29 = arith.constant 0 : index
    %c0_30 = arith.constant 0 : index
    %41 = vector.load %arg12[%c0_29, %c0_30] : memref<1x128xf32, #tpu.memory_space<vmem>>, vector<1x128xf32>
    %42 = vector.broadcast %41 : vector<1x128xf32> to vector<16x128xf32>
    %43 = arith.addf %40, %42 : vector<16x128xf32>
    %cst_31 = arith.constant 0.000000e+00 : f32
    %44 = vector.broadcast %cst_31 : f32 to vector<16x128xf32>
    %45 = arith.maximumf %43, %44 : vector<16x128xf32>
    %46 = arith.truncf %45 : vector<16x128xf32> to vector<16x128xbf16>
    %c0_32 = arith.constant 0 : index
    %c0_33 = arith.constant 0 : index
    %47 = vector.load %arg13[%c0_32, %c0_33] : memref<128x256xbf16, #tpu.memory_space<vmem>>, vector<128x256xbf16>
    %cst_34 = arith.constant dense<0.000000e+00> : vector<16x256xf32>
    %48 = tpu.matmul %46, %47, %cst_34 {dimension_numbers = #tpu.dot_dimension_numbers<[1], [0], [0], [1], [0, 0, 1, 1], [], []>} : vector<16x128xbf16>, vector<128x256xbf16>, vector<16x256xf32> -> vector<16x256xf32>
    %c0_35 = arith.constant 0 : index
    %c0_36 = arith.constant 0 : index
    %49 = vector.load %arg14[%c0_35, %c0_36] : memref<1x256xf32, #tpu.memory_space<vmem>>, vector<1x256xf32>
    %50 = vector.broadcast %49 : vector<1x256xf32> to vector<16x256xf32>
    %51 = arith.addf %48, %50 : vector<16x256xf32>
    %52 = arith.negf %51 : vector<16x256xf32>
    %53 = math.exp %52 : vector<16x256xf32>
    %cst_37 = arith.constant 1.000000e+00 : f32
    %54 = vector.broadcast %cst_37 : f32 to vector<16x256xf32>
    %55 = arith.addf %54, %53 : vector<16x256xf32>
    %56 = arith.divf %54, %55 : vector<16x256xf32>
    %57 = arith.truncf %56 : vector<16x256xf32> to vector<16x256xbf16>
    %c0_38 = arith.constant 0 : index
    %c0_39 = arith.constant 0 : index
    %58 = vector.load %arg15[%c0_38, %c0_39] : memref<16x256xbf16, #tpu.memory_space<vmem>>, vector<16x256xbf16>
    tpu.vector_store %arg15[%c0_38, %c0_39], %57 {strides = array<i32>} : memref<16x256xbf16, #tpu.memory_space<vmem>>, vector<16x256xbf16>,
    %c0_40 = arith.constant 0 : index
    %c0_41 = arith.constant 0 : index
    %59 = vector.load %arg16[%c0_40, %c0_41] : memref<16x128xf32, #tpu.memory_space<vmem>>, vector<16x128xf32>
    tpu.vector_store %arg16[%c0_40, %c0_41], %21 {strides = array<i32>} : memref<16x128xf32, #tpu.memory_space<vmem>>, vector<16x128xf32>,
    return
  }
  func.func @transform_0(%arg0: i32) -> (i32, i32) {
    %c0_i32 = arith.constant 0 : i32
    %c0_i32_0 = arith.constant 0 : i32
    return %arg0, %c0_i32 : i32, i32
  }
  func.func @transform_1(%arg0: i32) -> (i32, i32) {
    %c0_i32 = arith.constant 0 : i32
    %c0_i32_0 = arith.constant 0 : i32
    return %arg0, %c0_i32 : i32, i32
  }
  func.func @transform_2(%arg0: i32) -> (i32, i32) {
    %c0_i32 = arith.constant 0 : i32
    %c0_i32_0 = arith.constant 0 : i32
    %c0_i32_1 = arith.constant 0 : i32
    return %c0_i32, %c0_i32_0 : i32, i32
  }
  func.func @transform_3(%arg0: i32) -> (i32, i32) {
    %c0_i32 = arith.constant 0 : i32
    %c0_i32_0 = arith.constant 0 : i32
    %c0_i32_1 = arith.constant 0 : i32
    return %c0_i32, %c0_i32_0 : i32, i32
  }
  func.func @transform_4(%arg0: i32) -> (i32, i32) {
    %c0_i32 = arith.constant 0 : i32
    %c0_i32_0 = arith.constant 0 : i32
    %c0_i32_1 = arith.constant 0 : i32
    return %c0_i32, %c0_i32_0 : i32, i32
  }
  func.func @transform_5(%arg0: i32) -> (i32, i32) {
    %c0_i32 = arith.constant 0 : i32
    %c0_i32_0 = arith.constant 0 : i32
    %c0_i32_1 = arith.constant 0 : i32
    return %c0_i32, %c0_i32_0 : i32, i32
  }
  func.func @transform_6(%arg0: i32) -> (i32, i32) {
    %c0_i32 = arith.constant 0 : i32
    %c0_i32_0 = arith.constant 0 : i32
    %c0_i32_1 = arith.constant 0 : i32
    return %c0_i32, %c0_i32_0 : i32, i32
  }
  func.func @transform_7(%arg0: i32) -> (i32, i32) {
    %c0_i32 = arith.constant 0 : i32
    %c0_i32_0 = arith.constant 0 : i32
    %c0_i32_1 = arith.constant 0 : i32
    return %c0_i32, %c0_i32_0 : i32, i32
  }
  func.func @transform_8(%arg0: i32) -> (i32, i32) {
    %c0_i32 = arith.constant 0 : i32
    %c0_i32_0 = arith.constant 0 : i32
    %c0_i32_1 = arith.constant 0 : i32
    return %c0_i32, %c0_i32_0 : i32, i32
  }
  func.func @transform_9(%arg0: i32) -> (i32, i32) {
    %c0_i32 = arith.constant 0 : i32
    %c0_i32_0 = arith.constant 0 : i32
    %c0_i32_1 = arith.constant 0 : i32
    return %c0_i32, %c0_i32_0 : i32, i32
  }
  func.func @transform_10(%arg0: i32) -> (i32, i32) {
    %c0_i32 = arith.constant 0 : i32
    %c0_i32_0 = arith.constant 0 : i32
    %c0_i32_1 = arith.constant 0 : i32
    return %c0_i32, %c0_i32_0 : i32, i32
  }
  func.func @transform_11(%arg0: i32) -> (i32, i32) {
    %c0_i32 = arith.constant 0 : i32
    %c0_i32_0 = arith.constant 0 : i32
    %c0_i32_1 = arith.constant 0 : i32
    return %c0_i32, %c0_i32_0 : i32, i32
  }
  func.func @transform_12(%arg0: i32) -> (i32, i32) {
    %c0_i32 = arith.constant 0 : i32
    %c0_i32_0 = arith.constant 0 : i32
    %c0_i32_1 = arith.constant 0 : i32
    return %c0_i32, %c0_i32_0 : i32, i32
  }
  func.func @transform_13(%arg0: i32) -> (i32, i32) {
    %c0_i32 = arith.constant 0 : i32
    %c0_i32_0 = arith.constant 0 : i32
    %c0_i32_1 = arith.constant 0 : i32
    return %c0_i32, %c0_i32_0 : i32, i32
  }
  func.func @transform_14(%arg0: i32) -> (i32, i32) {
    %c0_i32 = arith.constant 0 : i32
    %c0_i32_0 = arith.constant 0 : i32
    return %arg0, %c0_i32 : i32, i32
  }
  func.func @transform_15(%arg0: i32) -> (i32, i32) {
    %c0_i32 = arith.constant 0 : i32
    %c0_i32_0 = arith.constant 0 : i32
    return %arg0, %c0_i32 : i32, i32
  }
}

module attributes {stable_mosaic.version = 11 : i64} {
  func.func @vae_kernel(%arg0: i32, %arg1: memref<16x256xbf16, #tpu.memory_space<vmem>>, %arg2: memref<16x64xf32, #tpu.memory_space<vmem>>, %arg3: memref<256x128xbf16, #tpu.memory_space<vmem>>, %arg4: memref<1x128xf32, #tpu.memory_space<vmem>>, %arg5: memref<128x64xbf16, #tpu.memory_space<vmem>>, %arg6: memref<1x64xf32, #tpu.memory_space<vmem>>, %arg7: memref<64x128xbf16, #tpu.memory_space<vmem>>, %arg8: memref<1x128xf32, #tpu.memory_space<vmem>>, %arg9: memref<64x64xbf16, #tpu.memory_space<vmem>>, %arg10: memref<1x64xf32, #tpu.memory_space<vmem>>, %arg11: memref<64x128xbf16, #tpu.memory_space<vmem>>, %arg12: memref<1x128xf32, #tpu.memory_space<vmem>>, %arg13: memref<128x256xbf16, #tpu.memory_space<vmem>>, %arg14: memref<1x256xf32, #tpu.memory_space<vmem>>, %arg15: memref<16x256xbf16, #tpu.memory_space<vmem>>, %arg16: memref<16x128xf32, #tpu.memory_space<vmem>>) attributes {dimension_semantics = [#tpu.dimension_semantics<parallel>], iteration_bounds = array<i64: 1>, scalar_prefetch = 0 : i64, scratch_operands = 0 : i64, tpu.core_type = #tpu.core_type<tc>, window_params = [{transform_indices = @transform_0, window_bounds = array<i64: 16, 256>}, {transform_indices = @transform_1, window_bounds = array<i64: 16, 64>}, {pipeline_mode = #tpu.pipeline_mode<synchronous>, transform_indices = @transform_2, window_bounds = array<i64: 256, 128>}, {pipeline_mode = #tpu.pipeline_mode<synchronous>, transform_indices = @transform_3, window_bounds = array<i64: 1, 128>}, {pipeline_mode = #tpu.pipeline_mode<synchronous>, transform_indices = @transform_4, window_bounds = array<i64: 128, 64>}, {pipeline_mode = #tpu.pipeline_mode<synchronous>, transform_indices = @transform_5, window_bounds = array<i64: 1, 64>}, {pipeline_mode = #tpu.pipeline_mode<synchronous>, transform_indices = @transform_6, window_bounds = array<i64: 64, 128>}, {pipeline_mode = #tpu.pipeline_mode<synchronous>, transform_indices = @transform_7, window_bounds = array<i64: 1, 128>}, {pipeline_mode = #tpu.pipeline_mode<synchronous>, transform_indices = @transform_8, window_bounds = array<i64: 64, 64>}, {pipeline_mode = #tpu.pipeline_mode<synchronous>, transform_indices = @transform_9, window_bounds = array<i64: 1, 64>}, {pipeline_mode = #tpu.pipeline_mode<synchronous>, transform_indices = @transform_10, window_bounds = array<i64: 64, 128>}, {pipeline_mode = #tpu.pipeline_mode<synchronous>, transform_indices = @transform_11, window_bounds = array<i64: 1, 128>}, {pipeline_mode = #tpu.pipeline_mode<synchronous>, transform_indices = @transform_12, window_bounds = array<i64: 128, 256>}, {pipeline_mode = #tpu.pipeline_mode<synchronous>, transform_indices = @transform_13, window_bounds = array<i64: 1, 256>}, {transform_indices = @transform_14, window_bounds = array<i64: 16, 256>}, {transform_indices = @transform_15, window_bounds = array<i64: 16, 128>}]} {
    %c0 = arith.constant 0 : index
    %c0_0 = arith.constant 0 : index
    %0 = vector.load %arg1[%c0, %c0_0] : memref<16x256xbf16, #tpu.memory_space<vmem>>, vector<16x256xbf16>
    %c0_1 = arith.constant 0 : index
    %c0_2 = arith.constant 0 : index
    %1 = vector.load %arg3[%c0_1, %c0_2] : memref<256x128xbf16, #tpu.memory_space<vmem>>, vector<256x128xbf16>
    %cst = arith.constant dense<0.000000e+00> : vector<16x128xf32>
    %2 = tpu.matmul %0, %1, %cst {dimension_numbers = #tpu.dot_dimension_numbers<[1], [0], [0], [1], [0, 0, 1, 1], [], []>} : vector<16x256xbf16>, vector<256x128xbf16>, vector<16x128xf32> -> vector<16x128xf32>
    %c0_3 = arith.constant 0 : index
    %c0_4 = arith.constant 0 : index
    %3 = vector.load %arg4[%c0_3, %c0_4] : memref<1x128xf32, #tpu.memory_space<vmem>>, vector<1x128xf32>
    %4 = vector.broadcast %3 : vector<1x128xf32> to vector<16x128xf32>
    %5 = arith.addf %2, %4 : vector<16x128xf32>
    %cst_5 = arith.constant 0.000000e+00 : f32
    %6 = vector.broadcast %cst_5 : f32 to vector<16x128xf32>
    %7 = arith.maximumf %5, %6 : vector<16x128xf32>
    %8 = arith.truncf %7 : vector<16x128xf32> to vector<16x128xbf16>
    %c0_6 = arith.constant 0 : index
    %c0_7 = arith.constant 0 : index
    %9 = vector.load %arg5[%c0_6, %c0_7] : memref<128x64xbf16, #tpu.memory_space<vmem>>, vector<128x64xbf16>
    %cst_8 = arith.constant dense<0.000000e+00> : vector<16x64xf32>
    %10 = tpu.matmul %8, %9, %cst_8 {dimension_numbers = #tpu.dot_dimension_numbers<[1], [0], [0], [1], [0, 0, 1, 1], [], []>} : vector<16x128xbf16>, vector<128x64xbf16>, vector<16x64xf32> -> vector<16x64xf32>
    %c0_9 = arith.constant 0 : index
    %c0_10 = arith.constant 0 : index
    %11 = vector.load %arg6[%c0_9, %c0_10] : memref<1x64xf32, #tpu.memory_space<vmem>>, vector<1x64xf32>
    %12 = vector.broadcast %11 : vector<1x64xf32> to vector<16x64xf32>
    %13 = arith.addf %10, %12 : vector<16x64xf32>
    %cst_11 = arith.constant 0.000000e+00 : f32
    %14 = vector.broadcast %cst_11 : f32 to vector<16x64xf32>
    %15 = arith.maximumf %13, %14 : vector<16x64xf32>
    %16 = arith.truncf %15 : vector<16x64xf32> to vector<16x64xbf16>
    %c0_12 = arith.constant 0 : index
    %c0_13 = arith.constant 0 : index
    %17 = vector.load %arg7[%c0_12, %c0_13] : memref<64x128xbf16, #tpu.memory_space<vmem>>, vector<64x128xbf16>
    %cst_14 = arith.constant dense<0.000000e+00> : vector<16x128xf32>
    %18 = tpu.matmul %16, %17, %cst_14 {dimension_numbers = #tpu.dot_dimension_numbers<[1], [0], [0], [1], [0, 0, 1, 1], [], []>} : vector<16x64xbf16>, vector<64x128xbf16>, vector<16x128xf32> -> vector<16x128xf32>
    %c0_15 = arith.constant 0 : index
    %c0_16 = arith.constant 0 : index
    %19 = vector.load %arg8[%c0_15, %c0_16] : memref<1x128xf32, #tpu.memory_space<vmem>>, vector<1x128xf32>
    %20 = vector.broadcast %19 : vector<1x128xf32> to vector<16x128xf32>
    %21 = arith.addf %18, %20 : vector<16x128xf32>
    %22 = vector.extract_strided_slice %21 {offsets = [0, 0], sizes = [16, 64], strides = [1, 1]} : vector<16x128xf32> to vector<16x64xf32>
    %23 = vector.extract_strided_slice %21 {offsets = [0, 64], sizes = [16, 64], strides = [1, 1]} : vector<16x128xf32> to vector<16x64xf32>
    %c0_17 = arith.constant 0 : index
    %c0_18 = arith.constant 0 : index
    %24 = vector.load %arg2[%c0_17, %c0_18] : memref<16x64xf32, #tpu.memory_space<vmem>>, vector<16x64xf32>
    %cst_19 = arith.constant 5.000000e-01 : f32
    %25 = vector.broadcast %cst_19 : f32 to vector<16x64xf32>
    %26 = arith.mulf %25, %23 : vector<16x64xf32>
    %27 = math.exp %26 : vector<16x64xf32>
    %28 = arith.mulf %24, %27 : vector<16x64xf32>
    %29 = arith.addf %28, %22 : vector<16x64xf32>
    %30 = arith.truncf %29 : vector<16x64xf32> to vector<16x64xbf16>
    %c0_20 = arith.constant 0 : index
    %c0_21 = arith.constant 0 : index
    %31 = vector.load %arg9[%c0_20, %c0_21] : memref<64x64xbf16, #tpu.memory_space<vmem>>, vector<64x64xbf16>
    %cst_22 = arith.constant dense<0.000000e+00> : vector<16x64xf32>
    %32 = tpu.matmul %30, %31, %cst_22 {dimension_numbers = #tpu.dot_dimension_numbers<[1], [0], [0], [1], [0, 0, 1, 1], [], []>} : vector<16x64xbf16>, vector<64x64xbf16>, vector<16x64xf32> -> vector<16x64xf32>
    %c0_23 = arith.constant 0 : index
    %c0_24 = arith.constant 0 : index
    %33 = vector.load %arg10[%c0_23, %c0_24] : memref<1x64xf32, #tpu.memory_space<vmem>>, vector<1x64xf32>
    %34 = vector.broadcast %33 : vector<1x64xf32> to vector<16x64xf32>
    %35 = arith.addf %32, %34 : vector<16x64xf32>
    %cst_25 = arith.constant 0.000000e+00 : f32
    %36 = vector.broadcast %cst_25 : f32 to vector<16x64xf32>
    %37 = arith.maximumf %35, %36 : vector<16x64xf32>
    %38 = arith.truncf %37 : vector<16x64xf32> to vector<16x64xbf16>
    %c0_26 = arith.constant 0 : index
    %c0_27 = arith.constant 0 : index
    %39 = vector.load %arg11[%c0_26, %c0_27] : memref<64x128xbf16, #tpu.memory_space<vmem>>, vector<64x128xbf16>
    %cst_28 = arith.constant dense<0.000000e+00> : vector<16x128xf32>
    %40 = tpu.matmul %38, %39, %cst_28 {dimension_numbers = #tpu.dot_dimension_numbers<[1], [0], [0], [1], [0, 0, 1, 1], [], []>} : vector<16x64xbf16>, vector<64x128xbf16>, vector<16x128xf32> -> vector<16x128xf32>
    %c0_29 = arith.constant 0 : index
    %c0_30 = arith.constant 0 : index
    %41 = vector.load %arg12[%c0_29, %c0_30] : memref<1x128xf32, #tpu.memory_space<vmem>>, vector<1x128xf32>
    %42 = vector.broadcast %41 : vector<1x128xf32> to vector<16x128xf32>
    %43 = arith.addf %40, %42 : vector<16x128xf32>
    %cst_31 = arith.constant 0.000000e+00 : f32
    %44 = vector.broadcast %cst_31 : f32 to vector<16x128xf32>
    %45 = arith.maximumf %43, %44 : vector<16x128xf32>
    %46 = arith.truncf %45 : vector<16x128xf32> to vector<16x128xbf16>
    %c0_32 = arith.constant 0 : index
    %c0_33 = arith.constant 0 : index
    %47 = vector.load %arg13[%c0_32, %c0_33] : memref<128x256xbf16, #tpu.memory_space<vmem>>, vector<128x256xbf16>
    %cst_34 = arith.constant dense<0.000000e+00> : vector<16x256xf32>
    %48 = tpu.matmul %46, %47, %cst_34 {dimension_numbers = #tpu.dot_dimension_numbers<[1], [0], [0], [1], [0, 0, 1, 1], [], []>} : vector<16x128xbf16>, vector<128x256xbf16>, vector<16x256xf32> -> vector<16x256xf32>
    %c0_35 = arith.constant 0 : index
    %c0_36 = arith.constant 0 : index
    %49 = vector.load %arg14[%c0_35, %c0_36] : memref<1x256xf32, #tpu.memory_space<vmem>>, vector<1x256xf32>
    %50 = vector.broadcast %49 : vector<1x256xf32> to vector<16x256xf32>
    %51 = arith.addf %48, %50 : vector<16x256xf32>
    %52 = arith.negf %51 : vector<16x256xf32>
    %53 = math.exp %52 : vector<16x256xf32>
    %cst_37 = arith.constant 1.000000e+00 : f32
    %54 = vector.broadcast %cst_37 : f32 to vector<16x256xf32>
    %55 = arith.addf %54, %53 : vector<16x256xf32>
    %56 = arith.divf %54, %55 : vector<16x256xf32>
    %57 = arith.truncf %56 : vector<16x256xf32> to vector<16x256xbf16>
    %c0_38 = arith.constant 0 : index
    %c0_39 = arith.constant 0 : index
    %58 = vector.load %arg15[%c0_38, %c0_39] : memref<16x256xbf16, #tpu.memory_space<vmem>>, vector<16x256xbf16>
    tpu.vector_store %arg15[%c0_38, %c0_39], %57 {strides = array<i32>} : memref<16x256xbf16, #tpu.memory_space<vmem>>, vector<16x256xbf16>,
    %c0_40 = arith.constant 0 : index
    %c0_41 = arith.constant 0 : index
    %59 = vector.load %arg16[%c0_40, %c0_41] : memref<16x128xf32, #tpu.memory_space<vmem>>, vector<16x128xf32>
    tpu.vector_store %arg16[%c0_40, %c0_41], %21 {strides = array<i32>} : memref<16x128xf32, #tpu.memory_space<vmem>>, vector<16x128xf32>,
    return
  }
  func.func @transform_0(%arg0: i32) -> (i32, i32) {
    %c0_i32 = arith.constant 0 : i32
    %c0_i32_0 = arith.constant 0 : i32
    return %arg0, %c0_i32 : i32, i32
  }
  func.func @transform_1(%arg0: i32) -> (i32, i32) {
    %c0_i32 = arith.constant 0 : i32
    %c0_i32_0 = arith.constant 0 : i32
    return %arg0, %c0_i32 : i32, i32
  }
  func.func @transform_2(%arg0: i32) -> (i32, i32) {
    %c0_i32 = arith.constant 0 : i32
    %c0_i32_0 = arith.constant 0 : i32
    %c0_i32_1 = arith.constant 0 : i32
    return %c0_i32, %c0_i32_0 : i32, i32
  }
  func.func @transform_3(%arg0: i32) -> (i32, i32) {
    %c0_i32 = arith.constant 0 : i32
    %c0_i32_0 = arith.constant 0 : i32
    %c0_i32_1 = arith.constant 0 : i32
    return %c0_i32, %c0_i32_0 : i32, i32
  }
  func.func @transform_4(%arg0: i32) -> (i32, i32) {
    %c0_i32 = arith.constant 0 : i32
    %c0_i32_0 = arith.constant 0 : i32
    %c0_i32_1 = arith.constant 0 : i32
    return %c0_i32, %c0_i32_0 : i32, i32
  }
  func.func @transform_5(%arg0: i32) -> (i32, i32) {
    %c0_i32 = arith.constant 0 : i32
    %c0_i32_0 = arith.constant 0 : i32
    %c0_i32_1 = arith.constant 0 : i32
    return %c0_i32, %c0_i32_0 : i32, i32
  }
  func.func @transform_6(%arg0: i32) -> (i32, i32) {
    %c0_i32 = arith.constant 0 : i32
    %c0_i32_0 = arith.constant 0 : i32
    %c0_i32_1 = arith.constant 0 : i32
    return %c0_i32, %c0_i32_0 : i32, i32
  }
  func.func @transform_7(%arg0: i32) -> (i32, i32) {
    %c0_i32 = arith.constant 0 : i32
    %c0_i32_0 = arith.constant 0 : i32
    %c0_i32_1 = arith.constant 0 : i32
    return %c0_i32, %c0_i32_0 : i32, i32
  }
  func.func @transform_8(%arg0: i32) -> (i32, i32) {
    %c0_i32 = arith.constant 0 : i32
    %c0_i32_0 = arith.constant 0 : i32
    %c0_i32_1 = arith.constant 0 : i32
    return %c0_i32, %c0_i32_0 : i32, i32
  }
  func.func @transform_9(%arg0: i32) -> (i32, i32) {
    %c0_i32 = arith.constant 0 : i32
    %c0_i32_0 = arith.constant 0 : i32
    %c0_i32_1 = arith.constant 0 : i32
    return %c0_i32, %c0_i32_0 : i32, i32
  }
  func.func @transform_10(%arg0: i32) -> (i32, i32) {
    %c0_i32 = arith.constant 0 : i32
    %c0_i32_0 = arith.constant 0 : i32
    %c0_i32_1 = arith.constant 0 : i32
    return %c0_i32, %c0_i32_0 : i32, i32
  }
  func.func @transform_11(%arg0: i32) -> (i32, i32) {
    %c0_i32 = arith.constant 0 : i32
    %c0_i32_0 = arith.constant 0 : i32
    %c0_i32_1 = arith.constant 0 : i32
    return %c0_i32, %c0_i32_0 : i32, i32
  }
  func.func @transform_12(%arg0: i32) -> (i32, i32) {
    %c0_i32 = arith.constant 0 : i32
    %c0_i32_0 = arith.constant 0 : i32
    %c0_i32_1 = arith.constant 0 : i32
    return %c0_i32, %c0_i32_0 : i32, i32
  }
  func.func @transform_13(%arg0: i32) -> (i32, i32) {
    %c0_i32 = arith.constant 0 : i32
    %c0_i32_0 = arith.constant 0 : i32
    %c0_i32_1 = arith.constant 0 : i32
    return %c0_i32, %c0_i32_0 : i32, i32
  }
  func.func @transform_14(%arg0: i32) -> (i32, i32) {
    %c0_i32 = arith.constant 0 : i32
    %c0_i32_0 = arith.constant 0 : i32
    return %arg0, %c0_i32 : i32, i32
  }
  func.func @transform_15(%arg0: i32) -> (i32, i32) {
    %c0_i32 = arith.constant 0 : i32
    %c0_i32_0 = arith.constant 0 : i32
    return %arg0, %c0_i32 : i32, i32
  }
}

</mosaic_0001>

<bundles_post_ra>
// kernel: tpu_custom_call.1
= control target key start
LH: loop header
LB: loop body
LE: loop exit
PB: predicated region body
PF: predicated region fallthrough
CT: control target
= control target key end

     0   :  { %21 = vsyncpa [#allocation3], 0  ;;  %s1526_s0 = inlined_call_operand.hbm [shape: bf16[16,256], index: 0, kind: input, shape index: {}]   ;;  %s1527_s1 = inlined_call_operand.hbm [shape: f32[16,64], index: 1, kind: input, shape index: {}]   ;;  %s1528_s2 = inlined_call_operand.hbm [shape: bf16[256,128], index: 2, kind: input, shape index: {}]   ;;  %s1529_s3 = inlined_call_operand.vmem [shape: f32[1,128], index: 3, kind: input, shape index: {}]   ;;  %s1530_s4 = inlined_call_operand.vmem [shape: bf16[128,64], index: 4, kind: input, shape index: {}]   ;;  %s1531_s5 = inlined_call_operand.hbm [shape: f32[1,64], index: 5, kind: input, shape index: {}]   ;;  %s1532_s6 = inlined_call_operand.vmem [shape: bf16[64,128], index: 6, kind: input, shape index: {}]   ;;  %s1533_s7 = inlined_call_operand.vmem [shape: f32[1,128], index: 7, kind: input, shape index: {}]   ;;  %s1534_s8 = inlined_call_operand.vmem [shape: bf16[64,64], index: 8, kind: input, shape index: {}]   ;;  %s1535_s9 = inlined_call_operand.vmem [shape: f32[1,64], index: 9, kind: input, shape index: {}]   ;;  %s1536_s10 = inlined_call_operand.vmem [shape: bf16[64,128], index: 10, kind: input, shape index: {}]   ;;  %s1537_s11 = inlined_call_operand.vmem [shape: f32[1,128], index: 11, kind: input, shape index: {}]   ;;  %s1538_s12 = inlined_call_operand.hbm [shape: bf16[128,256], index: 12, kind: input, shape index: {}]   ;;  %s1539_s13 = inlined_call_operand.vmem [shape: f32[1,256], index: 13, kind: input, shape index: {}]   ;;  %s1540_s14 = inlined_call_operand.hbm [shape: bf16[16,256], index: 14, kind: output, shape index: {0}]   ;;  %s1541_s15 = inlined_call_operand.hbm [shape: f32[16,128], index: 15, kind: output, shape index: {1}]  }
   0x1   :  { %22 = vsyncpa [#allocation6], 0 }
   0x2   :  { %23 = vsyncpa [#allocation9], 0 }
   0x3   :  { %24 = vsyncpa [#allocation4], 0 }
   0x4   :  { %25 = vsyncpa [#allocation13], 0  ;;  %s43_s20 = sshll.u32 %s1527_s1, 4  ;;  %s1317_s21 = smov [#allocation5]   ;;  %s44_s20 = int_to_ptr.hbm [resolvable:$true] %s43_s20 }
   0x5   :  { %s45_s22 = sshll.u32 %s1317_s21, 4  ;;  %s74_s25 = sshll.u32 %s1531_s5, 4  ;;  %s46_s22 = int_to_ptr.vmem [resolvable:$true] %s45_s22  ;;  %s75_s25 = int_to_ptr.hbm [resolvable:$true] %s74_s25 }
   0x6   :  { %s1318_s26 = smov 128   ;;  %s1319_s27 = smov 8  }
   0x7   :  { %51 = dma.hbm_to_vmem [thread:$0]  %s44_s20, 256, %s46_s22, [#allocation6], %s1318_s26, %s1318_s26, %s1319_s27  }
   0x8   :  { %s1320_s28 = smov [#allocation8]   ;;  %s30_s1 = sshll.u32 %s1526_s0, 4  ;;  %s31_s1 = int_to_ptr.hbm [resolvable:$true] %s30_s1 }
   0x9   :  { %s76_s29 = sshll.u32 %s1320_s28, 4  ;;  %s56_s5 = sshll.u32 %s1528_s2, 4  ;;  %s77_s29 = int_to_ptr.vmem [resolvable:$true] %s76_s29  ;;  %s57_s5 = int_to_ptr.hbm [resolvable:$true] %s56_s5 }
   0xa   :  { %79 = dma.hbm_to_vmem [thread:$0]  %s75_s25, 16, %s77_s29, [#allocation9]  }
   0xb   :  { %s1321_s19 = smov [#allocation2]   ;;  %s1322_s20 = smov [#allocation7]  }
   0xc   :  { %s32_s21 = sshll.u32 %s1321_s19, 4  ;;  %s58_s22 = sshll.u32 %s1322_s20, 4  ;;  %s33_s21 = int_to_ptr.vmem [resolvable:$true] %s32_s21  ;;  %s59_s22 = int_to_ptr.vmem [resolvable:$true] %s58_s22 }
   0xd   :  { %38 = dma.hbm_to_vmem [thread:$0]  %s31_s1, 256, %s33_s21, [#allocation3], %s1318_s26, %s1318_s26, %s1319_s27  }
   0xe   :  { %s1323_s23 = smov 64   ;;  %s1324_s0 = smov 4  }
   0xf   :  { %64 = dma.hbm_to_vmem [thread:$0]  %s57_s5, 2048, %s59_s22, [#allocation6], %s1323_s23, %s1323_s23, %s1324_s0  }
  0x10   :  { %s96_s2 = sshll.u32 %s1538_s12, 4  ;;  %s1325_s28 = smov [#allocation10]   ;;  %s97_s2 = int_to_ptr.hbm [resolvable:$true] %s96_s2 }
  0x11   :  { %s98_s29 = sshll.u32 %s1325_s28, 4  ;;  %s99_s29 = int_to_ptr.vmem [resolvable:$true] %s98_s29 }
  0x12   :  { %104 = dma.hbm_to_vmem [thread:$0]  %s97_s2, 2048, %s99_s29, [#allocation9], %s1318_s26, %s1318_s26, %s1319_s27  }
  0x13   :  { %1307 = dma.done.wait [#allocation3], 256  }
  0x14   :  { %1308 = vsyncadd [#allocation3], 4294967040 }
  0x15   :  { %1309 = dma.done.wait [#allocation6], 2304  }
  0x16   :  { %1310 = vsyncadd [#allocation6], 4294964992 }
  0x17   :  { %1311 = dma.done.wait [#allocation9], 2064  }
  0x18   :  { %1312 = vsyncadd [#allocation9], 4294965232  ;;  %v1058_v0 = vld [vmem:[#allocation7 + $0x38] sm:$0xff]  ;;  %v1057_v2 = vld [vmem:[#allocation7 + $0x30] sm:$0xff]  ;;  %vm424_vm0 = vcmask 523264   ;;  %s1326_s17 = smov [#allocation12]  }
  0x19   :  { %v1066_v1 = vld [vmem:[#allocation7 + $0x78] sm:$0xff]  ;;  %272 = vmatpush.bf16.msra.mxu0 %v1058_v0  ;;  %v1065_v3 = vld [vmem:[#allocation7 + $0x70] sm:$0xff]  ;;  %v1056_v4 = vld [vmem:[#allocation7 + $0x28] sm:$0xff]  ;;  %s804_s18 = sshll.u32 %s1326_s17, 4  ;;  %s806_s21 = sshll.u32 %s1541_s15, 4  ;;  %s805_s18 = int_to_ptr.vmem [resolvable:$true] %s804_s18  ;;  %s807_s21 = int_to_ptr.hbm [resolvable:$true] %s806_s21 }
  0x1a   :  { %286 = vmatpush.bf16.msra.mxu1 %v1066_v1  ;;  %v1064_v5 = vld [vmem:[#allocation7 + $0x68] sm:$0xff]  ;;  %v1074_v6 = vld [vmem:[%s1530_s4 + $0x38] sm:$0xff]  ;;  %v1073_v7 = vld [vmem:[%s1530_s4 + $0x30] sm:$0xff] }
  0x1b   :  { %371 = vmatpush.bf16.msra.mxu2 %v1074_v6  ;;  %v1055_v8 = vld [vmem:[#allocation7 + $0x20] sm:$0xff]  ;;  %v1072_v10 = vld [vmem:[%s1530_s4 + $0x28] sm:$0xff]  ;;  %v1054_v11 = vld [vmem:[#allocation7 + $0x18] sm:$0xff] }
  0x1c   :  { %v1063_v9 = vld [vmem:[#allocation7 + $0x60] sm:$0xff]  ;;  %v1062_v12 = vld [vmem:[#allocation7 + $0x58] sm:$0xff]  ;;  %v1053_v14 = vld [vmem:[#allocation7 + $0x10] sm:$0xff] }
  0x1d   :  { %273 = vmatpush.bf16.msra.mxu0 %v1057_v2  ;;  %v1071_v13 = vld [vmem:[%s1530_s4 + $0x20] sm:$0xff]  ;;  %v1061_v15 = vld [vmem:[#allocation7 + $0x50] sm:$0xff]  ;;  %v1052_v16 = vld [vmem:[#allocation7 + $0x8] sm:$0xff] }
  0x1e   :  { %287 = vmatpush.bf16.msra.mxu1 %v1065_v3  ;;  %v1060_v17 = vld [vmem:[#allocation7 + $0x48] sm:$0xff]  ;;  %v1051_v18 = vld [vmem:[#allocation7] sm:$0xff]  ;;  %v1070_v26 = vld [vmem:[%s1530_s4 + $0x18] sm:$0xff] }
  0x1f   :  { %372 = vmatpush.bf16.msra.mxu2 %v1073_v7  ;;  %v1059_v19 = vld [vmem:[#allocation7 + $0x40] sm:$0xff]  ;;  %v1050_v21 = vld [vmem:[#allocation2 + $0x4] sm:$0xf0]  ;;  %v830_v23 = vld [vmem:[#allocation2 + $0x8] sm:$0xf0] }
  0x20   :  { %v828_v20 = vld [vmem:[#allocation2] sm:$0xf]  ;;  %v1049_v22 = vld [vmem:[#allocation2 + $0x4] sm:$0xf]  ;;  %v1069_v27 = vld [vmem:[%s1530_s4 + $0x10] sm:$0xff] }
  0x21   :  { %274 = vmatpush.bf16.msra.mxu0 %v1056_v4  ;;  %v829_v24 = vor.u32 %v1050_v21, %v828_v20  ;;  %v833_v25 = vor.u32 %v1049_v22, %v830_v23  ;;  %v1068_v28 = vld [vmem:[%s1530_s4 + $0x8] sm:$0xff]  ;;  %v1067_v29 = vld [vmem:[%s1530_s4] sm:$0xff]  ;;  %v1078_v42 = vld [vmem:[%s1532_s6 + $0x18] sm:$0xff] }
  0x22   :  { %288 = vmatpush.bf16.msra.mxu1 %v1064_v5  ;;  %v1114_v32 = vld [vmem:[%s1529_s3] ss:$0 sm:$0xff]  ;;  %432 = vmatpush.bf16.msra.mxu3 %v1078_v42  ;;  %v1077_v43 = vld [vmem:[%s1532_s6 + $0x10] sm:$0xff]  ;;  %v1076_v44 = vld [vmem:[%s1532_s6 + $0x8] sm:$0xff] }
  0x23   :  { %373 = vmatpush.bf16.msra.mxu2 %v1072_v10  ;;  %v1075_v45 = vld [vmem:[%s1532_s6] sm:$0xff]  ;;  %v1082_v54 = vld [vmem:[%s1534_s8 + $0x18] sm:$0xff]  ;;  %v1081_v2 = vld [vmem:[%s1534_s8 + $0x10] sm:$0xff] }
  0x24   :  { %v1115_v47 = vld [vmem:[#allocation8] ss:$0 sm:$0xff]  ;;  %v1080_v3 = vld [vmem:[%s1534_s8 + $0x8] sm:$0xff]  ;;  %v1086_v5 = vld [vmem:[%s1536_s10 + $0x18] sm:$0xff] }
  0x25   :  { %275 = vmatpush.bf16.msra.mxu0 %v1055_v8  ;;  %v1116_v55 = vld [vmem:[%s1533_s7] ss:$0 sm:$0xff]  ;;  %v442_v7 = vld [vmem:[#allocation5] sm:$0xff]  ;;  %v443_v8 = vld [vmem:[#allocation5 + $0x8] sm:$0xff]  ;;  %s793_s7 = sshll.u32 %s1540_s14, 4  ;;  %s794_s7 = int_to_ptr.hbm [resolvable:$true] %s793_s7 }
  0x26   :  { %289 = vmatpush.bf16.msra.mxu1 %v1063_v9  ;;  %433 = vmatpush.bf16.msra.mxu3 %v1077_v43  ;;  %v1079_v4 = vld [vmem:[%s1534_s8] sm:$0xff]  ;;  %v1101_v20 = vld [vmem:[#allocation10 + $0x74] sm:$0xf] }
  0x27   :  { %374 = vmatpush.bf16.msra.mxu2 %v1071_v13  ;;  %v1041_v22 = vld [vmem:[#allocation10 + $0x78] sm:$0xf0]  ;;  %v1031_v23 = vld [vmem:[#allocation10 + $0x60] sm:$0xf] }
  0x28   :  { %v1117_v43 = vld [vmem:[%s1535_s9] ss:$0 sm:$0xff] }
  0x29   :  { %276 = vmatpush.bf16.msra.mxu0 %v1054_v11 }
  0x2a   :  { %290 = vmatpush.bf16.msra.mxu1 %v1062_v12  ;;  %434 = vmatpush.bf16.msra.mxu3 %v1076_v44 }
  0x2b   :  { %375 = vmatpush.bf16.msra.mxu2 %v1070_v26  ;;  %v1099_v26 = vld [vmem:[#allocation10 + $0x64] sm:$0xf] }
  0x2d   :  { %277 = vmatpush.bf16.msra.mxu0 %v1053_v14 }
  0x2e   :  { %291 = vmatpush.bf16.msra.mxu1 %v1061_v15  ;;  %435 = vmatpush.bf16.msra.mxu3 %v1075_v45  ;;  %v1085_v15 = vld [vmem:[%s1536_s10 + $0x10] sm:$0xff] }
  0x2f   :  { %376 = vmatpush.bf16.msra.mxu2 %v1069_v27  ;;  %v1033_v27 = vld [vmem:[#allocation10 + $0x68] sm:$0xf0] }
  0x31   :  { %278 = vmatpush.bf16.msra.mxu0 %v1052_v16  ;;  %v1084_v16 = vld [vmem:[%s1536_s10 + $0x8] sm:$0xff] }
  0x32   :  { %292 = vmatpush.bf16.msra.mxu1 %v1060_v17  ;;  %506 = vmatpush.bf16.msrb.mxu3 %v1082_v54  ;;  %v1083_v17 = vld [vmem:[%s1536_s10] sm:$0xff] }
  0x33   :  { %377 = vmatpush.bf16.msra.mxu2 %v1068_v28  ;;  %v1009_v54 = vld [vmem:[#allocation10 + $0x38] sm:$0xf0] }
  0x35   :  { %279 = vmatpush.bf16.msra.mxu0 %v1051_v18  ;;  %v1039_v18 = vld [vmem:[#allocation10 + $0x70] sm:$0xf] }
  0x36   :  { %293 = vmatpush.bf16.msra.mxu1 %v1059_v19  ;;  %507 = vmatpush.bf16.msrb.mxu3 %v1081_v2  ;;  %v1102_v19 = vld [vmem:[#allocation10 + $0x74] sm:$0xf0]  ;;  %v993_v2 = vld [vmem:[#allocation10 + $0x18] sm:$0xf0] }
  0x37   :  { %378 = vmatpush.bf16.msra.mxu2 %v1067_v29  ;;  %v1040_v21 = vor.u32 %v1102_v19, %v1039_v18  ;;  %v1036_v29 = vor.u32 %v1099_v26, %v1033_v27  ;;  %v591_v18 = vld [vmem:[%s1539_s13] sm:$0x3]  ;;  %s1327_s13 = smov [#allocation11]  }
  0x38   :  { %280 = vmatmul.bf16.vlgmr.msra.gmra.mxu0 %v829_v24  ;;  %v1100_v24 = vld [vmem:[#allocation10 + $0x64] sm:$0xf0]  ;;  %v593_v19 = vperm.slane %v591_v18, 0  ;;  %s791_s15 = sshll.u32 %s1327_s13, 4  ;;  %s792_s15 = int_to_ptr.vmem [resolvable:$true] %s791_s15 }
  0x39   :  { %294 = vmatmul.bf16.vlgmr.msra.gmra.mxu1 %v833_v25  ;;  %562 = vmatpush.bf16.msrb.mxu0 %v1086_v5  ;;  %v1044_v25 = vor.u32 %v1101_v20, %v1041_v22  ;;  %v1032_v28 = vor.u32 %v1100_v24, %v1031_v23  ;;  %v1088_v5 = vld [vmem:[#allocation10 + $0x4] sm:$0xf0]  ;;  %v594_v23 = vperm.slane %v591_v18, 1 }
  0x3a   :  { %508 = vmatpush.bf16.msrb.mxu3 %v1080_v3  ;;  %677 = vmatpush.bf16.msrb.mxu1 %v1040_v21 }
  0x3b   :  { %691 = vmatpush.bf16.msrb.mxu2 %v1044_v25 }
  0x3d   :  { %563 = vmatpush.bf16.msrb.mxu0 %v1085_v15 }
  0x3e   :  { %509 = vmatpush.bf16.msrb.mxu3 %v1079_v4  ;;  %678 = vmatpush.bf16.msrb.mxu1 %v1032_v28  ;;  %v983_v4 = vld [vmem:[#allocation10] sm:$0xf] }
  0x3f   :  { %692 = vmatpush.bf16.msrb.mxu2 %v1036_v29 }
  0x41   :  { %564 = vmatpush.bf16.msrb.mxu0 %v1084_v16 }
  0x45   :  { %565 = vmatpush.bf16.msrb.mxu0 %v1083_v17 }
  0xb5   :  { %v281_v30 = vpop.f32.mrf.mxu0 }
  0xb6   :  { %v295_v31 = vpop.f32.mrf.mxu1  ;;  %v282_v33 = vadd.f32 %v1114_v32, %v281_v30  ;;  %v1023_v30 = vld [vmem:[#allocation10 + $0x50] sm:$0xf] }
  0xb8   :  { %v296_v35 = vadd.f32 %v295_v31, %v282_v33  ;;  %v1098_v31 = vld [vmem:[#allocation10 + $0x54] sm:$0xf0]  ;;  %v1025_v33 = vld [vmem:[#allocation10 + $0x58] sm:$0xf0] }
  0xba   :  { %v300_v39 = vmax.f32 %v296_v35, 0.0 }
  0xbd   :  { %v283_v34 = vpop.f32.mrf.mxu0 }
  0xbe   :  { %v284_v36 = vadd.f32 %v1114_v32, %v283_v34  ;;  %v297_v37 = vpop.f32.mrf.mxu1  ;;  %v1097_v32 = vld [vmem:[#allocation10 + $0x54] sm:$0xf]  ;;  %v1024_v34 = vor.u32 %v1098_v31, %v1023_v30 }
  0xbf   :  { %v1028_v35 = vor.u32 %v1097_v32, %v1025_v33 }
  0xc0   :  { %v298_v38 = vadd.f32 %v297_v37, %v284_v36  ;;  %v1015_v36 = vld [vmem:[#allocation10 + $0x40] sm:$0xf]  ;;  %v1096_v37 = vld [vmem:[#allocation10 + $0x44] sm:$0xf0]  ;;  %679 = vmatpush.bf16.msrb.mxu1 %v1024_v34 }
  0xc1   :  { %693 = vmatpush.bf16.msrb.mxu2 %v1028_v35 }
  0xc2   :  { %v301_v40 = vmax.f32 %v298_v38, 0.0  ;;  %v1095_v38 = vld [vmem:[#allocation10 + $0x44] sm:$0xf] }
  0xc4   :  { %v302_v41 = vpack.c.bf16 %v301_v40, %v300_v39  ;;  %v1017_v39 = vld [vmem:[#allocation10 + $0x48] sm:$0xf0]  ;;  %v1016_v40 = vor.u32 %v1096_v37, %v1015_v36 }
  0xc6   :  { %379 = vmatmul.bf16.vlgmr.msra.gmra.mxu2 %v302_v41  ;;  %v1020_v41 = vor.u32 %v1095_v38, %v1017_v39  ;;  %680 = vmatpush.bf16.msrb.mxu1 %v1016_v40 }
  0xc8   :  { %694 = vmatpush.bf16.msrb.mxu2 %v1020_v41 }
 0x149   :  { %v380_v46 = vpop.f32.mrf.mxu2 }
 0x14a   :  { %v381_v48 = vadd.f32 %v1115_v47, %v380_v46 }
 0x14c   :  { %v385_v51 = vmax.f32 %v381_v48, 0.0 }
 0x151   :  { %v382_v49 = vpop.f32.mrf.mxu2 }
 0x152   :  { %v383_v50 = vadd.f32 %v1115_v47, %v382_v49 }
 0x154   :  { %v386_v52 = vmax.f32 %v383_v50, 0.0  ;;  %v1007_v50 = vld [vmem:[#allocation10 + $0x30] sm:$0xf] }
 0x156   :  { %v387_v53 = vpack.c.bf16 %v386_v52, %v385_v51  ;;  %v1094_v51 = vld [vmem:[#allocation10 + $0x34] sm:$0xf0]  ;;  %v1093_v52 = vld [vmem:[#allocation10 + $0x34] sm:$0xf] }
 0x158   :  { %946 = vmatmul.msk.bf16.vlgmr.msra.gmra.mxu3 %vm424_vm0, %v387_v53  ;;  %v1008_v53 = vor.u32 %v1094_v51, %v1007_v50 }
 0x15a   :  { %681 = vmatpush.bf16.msrb.mxu1 %v1008_v53 }
 0x1db   :  { %v437_v56 = vpop.f32.mrf.mxu3 }
 0x1dc   :  { %v438_v57 = vadd.f32 %v1116_v55, %v437_v56  ;;  %v999_v56 = vld [vmem:[#allocation10 + $0x20] sm:$0xf] }
 0x1de   :  { %785 = vst [vmem:[#allocation12] sm:$0xff] %v438_v57  ;;  %v444_v58 = vmul.f32 0.5, %v438_v57 }
 0x1e0   :  { %v446_v59 = vmul.f32 1.442695, %v444_v58  ;;  %v1091_v58 = vld [vmem:[#allocation10 + $0x24] sm:$0xf] }
 0x1e2   :  { %1119 = vpow2.f32 %v446_v59 }
 0x1e3   :  { %v439_v60 = vpop.f32.mrf.mxu3 }
 0x1e4   :  { %v440_v61 = vadd.f32 %v1116_v55, %v439_v60  ;;  %v1012_v55 = vor.u32 %v1093_v52, %v1009_v54  ;;  %v1001_v60 = vld [vmem:[#allocation10 + $0x28] sm:$0xf0] }
 0x1e6   :  { %v445_v62 = vmul.f32 0.5, %v440_v61  ;;  %786 = vst [vmem:[#allocation12 + $0x8] sm:$0xff] %v440_v61  ;;  %695 = vmatpush.bf16.msrb.mxu2 %v1012_v55 }
 0x1e7   :  { %812 = dma.vmem_to_hbm [thread:$0]  %s805_s18, 256, %s807_s21, [#allocation13], %s1318_s26, %s1318_s26, %s1319_s27  }
 0x1e8   :  { %v1120_v63 = vpop.eup %1119  ;;  %v448_v0 = vmul.f32 1.442695, %v445_v62  ;;  %v991_v62 = vld [vmem:[#allocation10 + $0x10] sm:$0xf] }
 0x1e9   :  { %452 = vrot.lane.b32.xlu0 %v1120_v63, %s1323_s23  ;;  %v1090_v63 = vld [vmem:[#allocation10 + $0x14] sm:$0xf0] }
 0x1ea   :  { %1121 = vpow2.f32 %v448_v0  ;;  %v1089_v0 = vld [vmem:[#allocation10 + $0x14] sm:$0xf] }
 0x1eb   :  { %v996_v3 = vor.u32 %v1089_v0, %v993_v2 }
 0x1f0   :  { %v1122_v1 = vpop.eup %1121 }
 0x1f1   :  { %454 = vrot.lane.b32.xlu0 %v1122_v1, %s1323_s23  ;;  %v992_v1 = vor.u32 %v1090_v63, %v991_v62 }
 0x25b   :  { %v453_v6 = vpop.permute.xlu0 %452 }
 0x25c   :  { %v458_v9 = vmul.f32 %v453_v6, %v442_v7  ;;  %v1087_v6 = vld [vmem:[#allocation10 + $0x4] sm:$0xf]  ;;  %v984_v7 = vor.u32 %v1088_v5, %v983_v4 }
 0x25e   :  { %v460_v12 = vadd.f32 %v458_v9, %v438_v57  ;;  %v1092_v57 = vld [vmem:[#allocation10 + $0x24] sm:$0xf0] }
 0x25f   :  { %v1000_v59 = vor.u32 %v1092_v57, %v999_v56 }
 0x261   :  { %682 = vmatpush.bf16.msrb.mxu1 %v1000_v59 }
 0x263   :  { %v455_v10 = vpop.permute.xlu0 %454 }
 0x264   :  { %v459_v11 = vmul.f32 %v455_v10, %v443_v8  ;;  %v985_v8 = vld [vmem:[#allocation10 + $0x8] sm:$0xf0] }
 0x265   :  { %683 = vmatpush.bf16.msrb.mxu1 %v992_v1  ;;  %v988_v9 = vor.u32 %v1087_v6, %v985_v8 }
 0x266   :  { %v461_v13 = vadd.f32 %v459_v11, %v440_v61  ;;  %v1004_v61 = vor.u32 %v1091_v58, %v1001_v60  ;;  %v1118_v11 = vld [vmem:[%s1537_s11] ss:$0 sm:$0xff] }
 0x268   :  { %v462_v14 = vpack.c.bf16 %v461_v13, %v460_v12  ;;  %696 = vmatpush.bf16.msrb.mxu2 %v1004_v61 }
 0x269   :  { %684 = vmatpush.bf16.msrb.mxu1 %v984_v7 }
 0x26a   :  { %963 = vmatmul.msk.bf16.vlgmr.msrb.gmra.mxu3 %vm424_vm0, %v462_v14 }
 0x26c   :  { %697 = vmatpush.bf16.msrb.mxu2 %v996_v3 }
 0x270   :  { %698 = vmatpush.bf16.msrb.mxu2 %v988_v9 }
 0x2ed   :  { %v511_v42 = vpop.f32.mrf.mxu3 }
 0x2ee   :  { %v512_v44 = vadd.f32 %v1117_v43, %v511_v42 }
 0x2f0   :  { %v516_v47 = vmax.f32 %v512_v44, 0.0 }
 0x2f5   :  { %v513_v45 = vpop.f32.mrf.mxu3 }
 0x2f6   :  { %v514_v46 = vadd.f32 %v1117_v43, %v513_v45 }
 0x2f8   :  { %v517_v48 = vmax.f32 %v514_v46, 0.0 }
 0x2fa   :  { %v518_v49 = vpack.c.bf16 %v517_v48, %v516_v47 }
 0x2fc   :  { %980 = vmatmul.msk.bf16.vlgmr.msrb.gmra.mxu0 %vm424_vm0, %v518_v49 }
 0x379   :  { %v567_v10 = vpop.f32.mrf.mxu0 }
 0x37a   :  { %v568_v12 = vadd.f32 %v1118_v11, %v567_v10 }
 0x37c   :  { %v572_v15 = vmax.f32 %v568_v12, 0.0 }
 0x381   :  { %v569_v13 = vpop.f32.mrf.mxu0 }
 0x382   :  { %v570_v14 = vadd.f32 %v1118_v11, %v569_v13 }
 0x384   :  { %v573_v16 = vmax.f32 %v570_v14, 0.0 }
 0x386   :  { %v574_v17 = vpack.c.bf16 %v573_v16, %v572_v15 }
 0x388   :  { %685 = vmatmul.bf16.vlgmr.msrb.gmra.mxu1 %v574_v17  ;;  %699 = vmatmul.bf16.vlgmr.msrb.gmra.mxu2 %v574_v17 }
 0x405   :  { %v686_v20 = vpop.f32.mrf.mxu1 }
 0x406   :  { %v687_v21 = vadd.f32 %v686_v20, %v593_v19 }
 0x408   :  { %v1045_v22 = vmul.f32 -1.442695, %v687_v21 }
 0x40a   :  { %1123 = vpow2.f32 %v1045_v22 }
 0x40b   :  { %v700_v24 = vpop.f32.mrf.mxu2 }
 0x40c   :  { %v701_v25 = vadd.f32 %v700_v24, %v594_v23 }
 0x40d   :  { %v688_v26 = vpop.f32.mrf.mxu1 }
 0x40e   :  { %v1046_v27 = vmul.f32 -1.442695, %v701_v25  ;;  %v689_v28 = vadd.f32 %v688_v26, %v593_v19 }
 0x410   :  { %v1124_v29 = vpop.eup %1123  ;;  %1125 = vpow2.f32 %v1046_v27  ;;  %v1047_v30 = vmul.f32 -1.442695, %v689_v28 }
 0x411   :  { %v717_v31 = vadd.f32 1.0, %v1124_v29 }
 0x412   :  { %1127 = vpow2.f32 %v1047_v30 }
 0x413   :  { %1129 = vrcp.f32 %v717_v31  ;;  %v702_v32 = vpop.f32.mrf.mxu2  ;;  %vm726_vm2 = vweird.f32 %v717_v31  ;;  %v730_v51 = vand.u32 2147483647, %v717_v31  ;;  %v732_v52 = vand.u32 2147483648, %v717_v31 }
 0x414   :  { %v703_v33 = vadd.f32 %v702_v32, %v594_v23 }
 0x415   :  { %v733_v61 = vor.u32 1.1754944e-38, %v732_v52  ;;  %vm731_vm7 = vcmp.eq.f32.partialorder %v730_v51, 8.507059e+37 }
 0x416   :  { %v1126_v34 = vpop.eup %1125  ;;  %v1048_v35 = vmul.f32 -1.442695, %v703_v33 }
 0x417   :  { %v718_v36 = vadd.f32 1.0, %v1126_v34 }
 0x418   :  { %v1128_v37 = vpop.eup %1127  ;;  %1131 = vpow2.f32 %v1048_v35 }
 0x419   :  { %v1130_v38 = vpop.eup %1129  ;;  %1133 = vrcp.f32 %v718_v36  ;;  %v719_v39 = vadd.f32 1.0, %v1128_v37  ;;  %v747_v53 = vand.u32 2147483648, %v718_v36  ;;  %v745_v56 = vand.u32 2147483647, %v718_v36 }
 0x41a   :  { %v722_v40 = vmul.f32 %v1130_v38, %v717_v31  ;;  %vm727_vm1 = vweird.f32 %v1130_v38  ;;  %vm741_vm5 = vweird.f32 %v718_v36 }
 0x41b   :  { %1135 = vrcp.f32 %v719_v39  ;;  %vm728_vm4 = vmor %vm726_vm2, %vm727_vm1  ;;  %v748_v62 = vor.u32 1.1754944e-38, %v747_v53  ;;  %vm746_vm8 = vcmp.eq.f32.partialorder %v745_v56, 8.507059e+37  ;;  %vm756_vm10 = vweird.f32 %v719_v39 }
 0x41c   :  { %v723_v41 = vsub.f32 1.0, %v722_v40  ;;  %v762_v6 = vand.u32 2147483648, %v719_v39  ;;  %v760_v8 = vand.u32 2147483647, %v719_v39 }
 0x41e   :  { %v1132_v42 = vpop.eup %1131  ;;  %v724_v43 = vmul.f32 %v1130_v38, %v723_v41  ;;  %v763_v13 = vor.u32 1.1754944e-38, %v762_v6  ;;  %vm761_vm15 = vcmp.eq.f32.partialorder %v760_v8, 8.507059e+37 }
 0x41f   :  { %v1134_v44 = vpop.eup %1133  ;;  %v720_v45 = vadd.f32 1.0, %v1132_v42 }
 0x420   :  { %v737_v46 = vmul.f32 %v1134_v44, %v718_v36  ;;  %v725_v50 = vadd.f32 %v1130_v38, %v724_v43  ;;  %vm742_vm3 = vweird.f32 %v1134_v44 }
 0x421   :  { %v1136_v47 = vpop.eup %1135  ;;  %1137 = vrcp.f32 %v720_v45  ;;  %vm743_vm6 = vmor %vm741_vm5, %vm742_vm3  ;;  %v777_v7 = vand.u32 2147483648, %v720_v45  ;;  %v775_v10 = vand.u32 2147483647, %v720_v45  ;;  %vm771_vm13 = vweird.f32 %v720_v45 }
 0x422   :  { %v738_v48 = vsub.f32 1.0, %v737_v46  ;;  %v752_v49 = vmul.f32 %v1136_v47, %v719_v39  ;;  %v729_v57 = vsel %vm728_vm4, %v1130_v38, %v725_v50  ;;  %vm757_vm9 = vweird.f32 %v1136_v47 }
 0x423   :  { %v734_v1 = vsel %vm731_vm7, %v733_v61, %v729_v57  ;;  %vm758_vm12 = vmor %vm756_vm10, %vm757_vm9  ;;  %v778_v14 = vor.u32 1.1754944e-38, %v777_v7  ;;  %vm776_vm0 = vcmp.eq.f32.partialorder %v775_v10, 8.507059e+37 }
 0x424   :  { %v753_v54 = vsub.f32 1.0, %v752_v49  ;;  %v739_v55 = vmul.f32 %v1134_v44, %v738_v48 }
 0x426   :  { %v740_v58 = vadd.f32 %v1134_v44, %v739_v55  ;;  %v754_v59 = vmul.f32 %v1136_v47, %v753_v54 }
 0x427   :  { %v1138_v60 = vpop.eup %1137 }
 0x428   :  { %v767_v63 = vmul.f32 %v1138_v60, %v720_v45  ;;  %v744_v0 = vsel %vm743_vm6, %v1134_v44, %v740_v58  ;;  %v755_v4 = vadd.f32 %v1136_v47, %v754_v59  ;;  %vm772_vm11 = vweird.f32 %v1138_v60 }
 0x429   :  { %v749_v2 = vsel %vm746_vm8, %v748_v62, %v744_v0  ;;  %vm773_vm14 = vmor %vm771_vm13, %vm772_vm11 }
 0x42a   :  { %v768_v3 = vsub.f32 1.0, %v767_v63  ;;  %v781_v5 = vpack.c.bf16 %v749_v2, %v734_v1  ;;  %v759_v11 = vsel %vm758_vm12, %v1136_v47, %v755_v4 }
 0x42b   :  { %v764_v16 = vsel %vm761_vm15, %v763_v13, %v759_v11 }
 0x42c   :  { %v769_v9 = vmul.f32 %v1138_v60, %v768_v3  ;;  %783 = vst [vmem:[#allocation11] sm:$0xff] %v781_v5 }
 0x42e   :  { %v770_v12 = vadd.f32 %v1138_v60, %v769_v9 }
 0x430   :  { %v774_v15 = vsel %vm773_vm14, %v1138_v60, %v770_v12 }
 0x431   :  { %v779_v17 = vsel %vm776_vm0, %v778_v14, %v774_v15 }
 0x432   :  { %v782_v18 = vpack.c.bf16 %v779_v17, %v764_v16 }
 0x434   :  { %784 = vst [vmem:[#allocation11 + $0x8] sm:$0xff] %v782_v18 }
 0x435   :  { %799 = dma.vmem_to_hbm [thread:$0]  %s792_s15, 256, %s794_s7, [#allocation4], %s1318_s26, %s1318_s26, %s1319_s27  }
 0x436   :  { %1313 = dma.done.wait [#allocation4], 256  }
 0x437   :  { %1314 = vsyncadd [#allocation4], 4294967040 }
 0x438   :  { %1315 = dma.done.wait [#allocation13], 256  }
 0x439   :  { %1316 = vsyncadd [#allocation13], 4294967040 }
 0x43a   :  { %821 = vsyncpa [#allocation3], 1 }
 0x43b   :  { %822 = vsyncpa [#allocation6], 1 }
 0x43c   :  { %823 = vsyncpa [#allocation9], 1 }
 0x43d   :  { %824 = vsyncpa [#allocation4], 1 }
 0x43e   :  { %825 = vsyncpa [#allocation13], 1 }

// kernel: tpu_custom_call.1
= control target key start
LH: loop header
LB: loop body
LE: loop exit
PB: predicated region body
PF: predicated region fallthrough
CT: control target
= control target key end

     0   :  { %21 = vsyncpa [#allocation3], 0  ;;  %s1526_s0 = inlined_call_operand.hbm [shape: bf16[16,256], index: 0, kind: input, shape index: {}]   ;;  %s1527_s1 = inlined_call_operand.hbm [shape: f32[16,64], index: 1, kind: input, shape index: {}]   ;;  %s1528_s2 = inlined_call_operand.hbm [shape: bf16[256,128], index: 2, kind: input, shape index: {}]   ;;  %s1529_s3 = inlined_call_operand.vmem [shape: f32[1,128], index: 3, kind: input, shape index: {}]   ;;  %s1530_s4 = inlined_call_operand.vmem [shape: bf16[128,64], index: 4, kind: input, shape index: {}]   ;;  %s1531_s5 = inlined_call_operand.hbm [shape: f32[1,64], index: 5, kind: input, shape index: {}]   ;;  %s1532_s6 = inlined_call_operand.vmem [shape: bf16[64,128], index: 6, kind: input, shape index: {}]   ;;  %s1533_s7 = inlined_call_operand.vmem [shape: f32[1,128], index: 7, kind: input, shape index: {}]   ;;  %s1534_s8 = inlined_call_operand.vmem [shape: bf16[64,64], index: 8, kind: input, shape index: {}]   ;;  %s1535_s9 = inlined_call_operand.vmem [shape: f32[1,64], index: 9, kind: input, shape index: {}]   ;;  %s1536_s10 = inlined_call_operand.vmem [shape: bf16[64,128], index: 10, kind: input, shape index: {}]   ;;  %s1537_s11 = inlined_call_operand.vmem [shape: f32[1,128], index: 11, kind: input, shape index: {}]   ;;  %s1538_s12 = inlined_call_operand.hbm [shape: bf16[128,256], index: 12, kind: input, shape index: {}]   ;;  %s1539_s13 = inlined_call_operand.vmem [shape: f32[1,256], index: 13, kind: input, shape index: {}]   ;;  %s1540_s14 = inlined_call_operand.hbm [shape: bf16[16,256], index: 14, kind: output, shape index: {0}]   ;;  %s1541_s15 = inlined_call_operand.hbm [shape: f32[16,128], index: 15, kind: output, shape index: {1}]  }
   0x1   :  { %22 = vsyncpa [#allocation6], 0 }
   0x2   :  { %23 = vsyncpa [#allocation9], 0 }
   0x3   :  { %24 = vsyncpa [#allocation4], 0 }
   0x4   :  { %25 = vsyncpa [#allocation13], 0  ;;  %s43_s20 = sshll.u32 %s1527_s1, 4  ;;  %s1317_s21 = smov [#allocation5]   ;;  %s44_s20 = int_to_ptr.hbm [resolvable:$true] %s43_s20 }
   0x5   :  { %s45_s22 = sshll.u32 %s1317_s21, 4  ;;  %s74_s25 = sshll.u32 %s1531_s5, 4  ;;  %s46_s22 = int_to_ptr.vmem [resolvable:$true] %s45_s22  ;;  %s75_s25 = int_to_ptr.hbm [resolvable:$true] %s74_s25 }
   0x6   :  { %s1318_s26 = smov 128   ;;  %s1319_s27 = smov 8  }
   0x7   :  { %51 = dma.hbm_to_vmem [thread:$0]  %s44_s20, 256, %s46_s22, [#allocation6], %s1318_s26, %s1318_s26, %s1319_s27  }
   0x8   :  { %s1320_s28 = smov [#allocation8]   ;;  %s30_s1 = sshll.u32 %s1526_s0, 4  ;;  %s31_s1 = int_to_ptr.hbm [resolvable:$true] %s30_s1 }
   0x9   :  { %s76_s29 = sshll.u32 %s1320_s28, 4  ;;  %s56_s5 = sshll.u32 %s1528_s2, 4  ;;  %s77_s29 = int_to_ptr.vmem [resolvable:$true] %s76_s29  ;;  %s57_s5 = int_to_ptr.hbm [resolvable:$true] %s56_s5 }
   0xa   :  { %79 = dma.hbm_to_vmem [thread:$0]  %s75_s25, 16, %s77_s29, [#allocation9]  }
   0xb   :  { %s1321_s19 = smov [#allocation2]   ;;  %s1322_s20 = smov [#allocation7]  }
   0xc   :  { %s32_s21 = sshll.u32 %s1321_s19, 4  ;;  %s58_s22 = sshll.u32 %s1322_s20, 4  ;;  %s33_s21 = int_to_ptr.vmem [resolvable:$true] %s32_s21  ;;  %s59_s22 = int_to_ptr.vmem [resolvable:$true] %s58_s22 }
   0xd   :  { %38 = dma.hbm_to_vmem [thread:$0]  %s31_s1, 256, %s33_s21, [#allocation3], %s1318_s26, %s1318_s26, %s1319_s27  }
   0xe   :  { %s1323_s23 = smov 64   ;;  %s1324_s0 = smov 4  }
   0xf   :  { %64 = dma.hbm_to_vmem [thread:$0]  %s57_s5, 2048, %s59_s22, [#allocation6], %s1323_s23, %s1323_s23, %s1324_s0  }
  0x10   :  { %s96_s2 = sshll.u32 %s1538_s12, 4  ;;  %s1325_s28 = smov [#allocation10]   ;;  %s97_s2 = int_to_ptr.hbm [resolvable:$true] %s96_s2 }
  0x11   :  { %s98_s29 = sshll.u32 %s1325_s28, 4  ;;  %s99_s29 = int_to_ptr.vmem [resolvable:$true] %s98_s29 }
  0x12   :  { %104 = dma.hbm_to_vmem [thread:$0]  %s97_s2, 2048, %s99_s29, [#allocation9], %s1318_s26, %s1318_s26, %s1319_s27  }
  0x13   :  { %1307 = dma.done.wait [#allocation3], 256  }
  0x14   :  { %1308 = vsyncadd [#allocation3], 4294967040 }
  0x15   :  { %1309 = dma.done.wait [#allocation6], 2304  }
  0x16   :  { %1310 = vsyncadd [#allocation6], 4294964992 }
  0x17   :  { %1311 = dma.done.wait [#allocation9], 2064  }
  0x18   :  { %1312 = vsyncadd [#allocation9], 4294965232  ;;  %v1058_v0 = vld [vmem:[#allocation7 + $0x38] sm:$0xff]  ;;  %v1057_v2 = vld [vmem:[#allocation7 + $0x30] sm:$0xff]  ;;  %vm424_vm0 = vcmask 523264   ;;  %s1326_s17 = smov [#allocation12]  }
  0x19   :  { %v1066_v1 = vld [vmem:[#allocation7 + $0x78] sm:$0xff]  ;;  %272 = vmatpush.bf16.msra.mxu0 %v1058_v0  ;;  %v1065_v3 = vld [vmem:[#allocation7 + $0x70] sm:$0xff]  ;;  %v1056_v4 = vld [vmem:[#allocation7 + $0x28] sm:$0xff]  ;;  %s804_s18 = sshll.u32 %s1326_s17, 4  ;;  %s806_s21 = sshll.u32 %s1541_s15, 4  ;;  %s805_s18 = int_to_ptr.vmem [resolvable:$true] %s804_s18  ;;  %s807_s21 = int_to_ptr.hbm [resolvable:$true] %s806_s21 }
  0x1a   :  { %286 = vmatpush.bf16.msra.mxu1 %v1066_v1  ;;  %v1064_v5 = vld [vmem:[#allocation7 + $0x68] sm:$0xff]  ;;  %v1074_v6 = vld [vmem:[%s1530_s4 + $0x38] sm:$0xff]  ;;  %v1073_v7 = vld [vmem:[%s1530_s4 + $0x30] sm:$0xff] }
  0x1b   :  { %371 = vmatpush.bf16.msra.mxu2 %v1074_v6  ;;  %v1055_v8 = vld [vmem:[#allocation7 + $0x20] sm:$0xff]  ;;  %v1072_v10 = vld [vmem:[%s1530_s4 + $0x28] sm:$0xff]  ;;  %v1054_v11 = vld [vmem:[#allocation7 + $0x18] sm:$0xff] }
  0x1c   :  { %v1063_v9 = vld [vmem:[#allocation7 + $0x60] sm:$0xff]  ;;  %v1062_v12 = vld [vmem:[#allocation7 + $0x58] sm:$0xff]  ;;  %v1053_v14 = vld [vmem:[#allocation7 + $0x10] sm:$0xff] }
  0x1d   :  { %273 = vmatpush.bf16.msra.mxu0 %v1057_v2  ;;  %v1071_v13 = vld [vmem:[%s1530_s4 + $0x20] sm:$0xff]  ;;  %v1061_v15 = vld [vmem:[#allocation7 + $0x50] sm:$0xff]  ;;  %v1052_v16 = vld [vmem:[#allocation7 + $0x8] sm:$0xff] }
  0x1e   :  { %287 = vmatpush.bf16.msra.mxu1 %v1065_v3  ;;  %v1060_v17 = vld [vmem:[#allocation7 + $0x48] sm:$0xff]  ;;  %v1051_v18 = vld [vmem:[#allocation7] sm:$0xff]  ;;  %v1070_v26 = vld [vmem:[%s1530_s4 + $0x18] sm:$0xff] }
  0x1f   :  { %372 = vmatpush.bf16.msra.mxu2 %v1073_v7  ;;  %v1059_v19 = vld [vmem:[#allocation7 + $0x40] sm:$0xff]  ;;  %v1050_v21 = vld [vmem:[#allocation2 + $0x4] sm:$0xf0]  ;;  %v830_v23 = vld [vmem:[#allocation2 + $0x8] sm:$0xf0] }
  0x20   :  { %v828_v20 = vld [vmem:[#allocation2] sm:$0xf]  ;;  %v1049_v22 = vld [vmem:[#allocation2 + $0x4] sm:$0xf]  ;;  %v1069_v27 = vld [vmem:[%s1530_s4 + $0x10] sm:$0xff] }
  0x21   :  { %274 = vmatpush.bf16.msra.mxu0 %v1056_v4  ;;  %v829_v24 = vor.u32 %v1050_v21, %v828_v20  ;;  %v833_v25 = vor.u32 %v1049_v22, %v830_v23  ;;  %v1068_v28 = vld [vmem:[%s1530_s4 + $0x8] sm:$0xff]  ;;  %v1067_v29 = vld [vmem:[%s1530_s4] sm:$0xff]  ;;  %v1078_v42 = vld [vmem:[%s1532_s6 + $0x18] sm:$0xff] }
  0x22   :  { %288 = vmatpush.bf16.msra.mxu1 %v1064_v5  ;;  %v1114_v32 = vld [vmem:[%s1529_s3] ss:$0 sm:$0xff]  ;;  %432 = vmatpush.bf16.msra.mxu3 %v1078_v42  ;;  %v1077_v43 = vld [vmem:[%s1532_s6 + $0x10] sm:$0xff]  ;;  %v1076_v44 = vld [vmem:[%s1532_s6 + $0x8] sm:$0xff] }
  0x23   :  { %373 = vmatpush.bf16.msra.mxu2 %v1072_v10  ;;  %v1075_v45 = vld [vmem:[%s1532_s6] sm:$0xff]  ;;  %v1082_v54 = vld [vmem:[%s1534_s8 + $0x18] sm:$0xff]  ;;  %v1081_v2 = vld [vmem:[%s1534_s8 + $0x10] sm:$0xff] }
  0x24   :  { %v1115_v47 = vld [vmem:[#allocation8] ss:$0 sm:$0xff]  ;;  %v1080_v3 = vld [vmem:[%s1534_s8 + $0x8] sm:$0xff]  ;;  %v1086_v5 = vld [vmem:[%s1536_s10 + $0x18] sm:$0xff] }
  0x25   :  { %275 = vmatpush.bf16.msra.mxu0 %v1055_v8  ;;  %v1116_v55 = vld [vmem:[%s1533_s7] ss:$0 sm:$0xff]  ;;  %v442_v7 = vld [vmem:[#allocation5] sm:$0xff]  ;;  %v443_v8 = vld [vmem:[#allocation5 + $0x8] sm:$0xff]  ;;  %s793_s7 = sshll.u32 %s1540_s14, 4  ;;  %s794_s7 = int_to_ptr.hbm [resolvable:$true] %s793_s7 }
  0x26   :  { %289 = vmatpush.bf16.msra.mxu1 %v1063_v9  ;;  %433 = vmatpush.bf16.msra.mxu3 %v1077_v43  ;;  %v1079_v4 = vld [vmem:[%s1534_s8] sm:$0xff]  ;;  %v1101_v20 = vld [vmem:[#allocation10 + $0x74] sm:$0xf] }
  0x27   :  { %374 = vmatpush.bf16.msra.mxu2 %v1071_v13  ;;  %v1041_v22 = vld [vmem:[#allocation10 + $0x78] sm:$0xf0]  ;;  %v1031_v23 = vld [vmem:[#allocation10 + $0x60] sm:$0xf] }
  0x28   :  { %v1117_v43 = vld [vmem:[%s1535_s9] ss:$0 sm:$0xff] }
  0x29   :  { %276 = vmatpush.bf16.msra.mxu0 %v1054_v11 }
  0x2a   :  { %290 = vmatpush.bf16.msra.mxu1 %v1062_v12  ;;  %434 = vmatpush.bf16.msra.mxu3 %v1076_v44 }
  0x2b   :  { %375 = vmatpush.bf16.msra.mxu2 %v1070_v26  ;;  %v1099_v26 = vld [vmem:[#allocation10 + $0x64] sm:$0xf] }
  0x2d   :  { %277 = vmatpush.bf16.msra.mxu0 %v1053_v14 }
  0x2e   :  { %291 = vmatpush.bf16.msra.mxu1 %v1061_v15  ;;  %435 = vmatpush.bf16.msra.mxu3 %v1075_v45  ;;  %v1085_v15 = vld [vmem:[%s1536_s10 + $0x10] sm:$0xff] }
  0x2f   :  { %376 = vmatpush.bf16.msra.mxu2 %v1069_v27  ;;  %v1033_v27 = vld [vmem:[#allocation10 + $0x68] sm:$0xf0] }
  0x31   :  { %278 = vmatpush.bf16.msra.mxu0 %v1052_v16  ;;  %v1084_v16 = vld [vmem:[%s1536_s10 + $0x8] sm:$0xff] }
  0x32   :  { %292 = vmatpush.bf16.msra.mxu1 %v1060_v17  ;;  %506 = vmatpush.bf16.msrb.mxu3 %v1082_v54  ;;  %v1083_v17 = vld [vmem:[%s1536_s10] sm:$0xff] }
  0x33   :  { %377 = vmatpush.bf16.msra.mxu2 %v1068_v28  ;;  %v1009_v54 = vld [vmem:[#allocation10 + $0x38] sm:$0xf0] }
  0x35   :  { %279 = vmatpush.bf16.msra.mxu0 %v1051_v18  ;;  %v1039_v18 = vld [vmem:[#allocation10 + $0x70] sm:$0xf] }
  0x36   :  { %293 = vmatpush.bf16.msra.mxu1 %v1059_v19  ;;  %507 = vmatpush.bf16.msrb.mxu3 %v1081_v2  ;;  %v1102_v19 = vld [vmem:[#allocation10 + $0x74] sm:$0xf0]  ;;  %v993_v2 = vld [vmem:[#allocation10 + $0x18] sm:$0xf0] }
  0x37   :  { %378 = vmatpush.bf16.msra.mxu2 %v1067_v29  ;;  %v1040_v21 = vor.u32 %v1102_v19, %v1039_v18  ;;  %v1036_v29 = vor.u32 %v1099_v26, %v1033_v27  ;;  %v591_v18 = vld [vmem:[%s1539_s13] sm:$0x3]  ;;  %s1327_s13 = smov [#allocation11]  }
  0x38   :  { %280 = vmatmul.bf16.vlgmr.msra.gmra.mxu0 %v829_v24  ;;  %v1100_v24 = vld [vmem:[#allocation10 + $0x64] sm:$0xf0]  ;;  %v593_v19 = vperm.slane %v591_v18, 0  ;;  %s791_s15 = sshll.u32 %s1327_s13, 4  ;;  %s792_s15 = int_to_ptr.vmem [resolvable:$true] %s791_s15 }
  0x39   :  { %294 = vmatmul.bf16.vlgmr.msra.gmra.mxu1 %v833_v25  ;;  %562 = vmatpush.bf16.msrb.mxu0 %v1086_v5  ;;  %v1044_v25 = vor.u32 %v1101_v20, %v1041_v22  ;;  %v1032_v28 = vor.u32 %v1100_v24, %v1031_v23  ;;  %v1088_v5 = vld [vmem:[#allocation10 + $0x4] sm:$0xf0]  ;;  %v594_v23 = vperm.slane %v591_v18, 1 }
  0x3a   :  { %508 = vmatpush.bf16.msrb.mxu3 %v1080_v3  ;;  %677 = vmatpush.bf16.msrb.mxu1 %v1040_v21 }
  0x3b   :  { %691 = vmatpush.bf16.msrb.mxu2 %v1044_v25 }
  0x3d   :  { %563 = vmatpush.bf16.msrb.mxu0 %v1085_v15 }
  0x3e   :  { %509 = vmatpush.bf16.msrb.mxu3 %v1079_v4  ;;  %678 = vmatpush.bf16.msrb.mxu1 %v1032_v28  ;;  %v983_v4 = vld [vmem:[#allocation10] sm:$0xf] }
  0x3f   :  { %692 = vmatpush.bf16.msrb.mxu2 %v1036_v29 }
  0x41   :  { %564 = vmatpush.bf16.msrb.mxu0 %v1084_v16 }
  0x45   :  { %565 = vmatpush.bf16.msrb.mxu0 %v1083_v17 }
  0xb5   :  { %v281_v30 = vpop.f32.mrf.mxu0 }
  0xb6   :  { %v295_v31 = vpop.f32.mrf.mxu1  ;;  %v282_v33 = vadd.f32 %v1114_v32, %v281_v30  ;;  %v1023_v30 = vld [vmem:[#allocation10 + $0x50] sm:$0xf] }
  0xb8   :  { %v296_v35 = vadd.f32 %v295_v31, %v282_v33  ;;  %v1098_v31 = vld [vmem:[#allocation10 + $0x54] sm:$0xf0]  ;;  %v1025_v33 = vld [vmem:[#allocation10 + $0x58] sm:$0xf0] }
  0xba   :  { %v300_v39 = vmax.f32 %v296_v35, 0.0 }
  0xbd   :  { %v283_v34 = vpop.f32.mrf.mxu0 }
  0xbe   :  { %v284_v36 = vadd.f32 %v1114_v32, %v283_v34  ;;  %v297_v37 = vpop.f32.mrf.mxu1  ;;  %v1097_v32 = vld [vmem:[#allocation10 + $0x54] sm:$0xf]  ;;  %v1024_v34 = vor.u32 %v1098_v31, %v1023_v30 }
  0xbf   :  { %v1028_v35 = vor.u32 %v1097_v32, %v1025_v33 }
  0xc0   :  { %v298_v38 = vadd.f32 %v297_v37, %v284_v36  ;;  %v1015_v36 = vld [vmem:[#allocation10 + $0x40] sm:$0xf]  ;;  %v1096_v37 = vld [vmem:[#allocation10 + $0x44] sm:$0xf0]  ;;  %679 = vmatpush.bf16.msrb.mxu1 %v1024_v34 }
  0xc1   :  { %693 = vmatpush.bf16.msrb.mxu2 %v1028_v35 }
  0xc2   :  { %v301_v40 = vmax.f32 %v298_v38, 0.0  ;;  %v1095_v38 = vld [vmem:[#allocation10 + $0x44] sm:$0xf] }
  0xc4   :  { %v302_v41 = vpack.c.bf16 %v301_v40, %v300_v39  ;;  %v1017_v39 = vld [vmem:[#allocation10 + $0x48] sm:$0xf0]  ;;  %v1016_v40 = vor.u32 %v1096_v37, %v1015_v36 }
  0xc6   :  { %379 = vmatmul.bf16.vlgmr.msra.gmra.mxu2 %v302_v41  ;;  %v1020_v41 = vor.u32 %v1095_v38, %v1017_v39  ;;  %680 = vmatpush.bf16.msrb.mxu1 %v1016_v40 }
  0xc8   :  { %694 = vmatpush.bf16.msrb.mxu2 %v1020_v41 }
 0x149   :  { %v380_v46 = vpop.f32.mrf.mxu2 }
 0x14a   :  { %v381_v48 = vadd.f32 %v1115_v47, %v380_v46 }
 0x14c   :  { %v385_v51 = vmax.f32 %v381_v48, 0.0 }
 0x151   :  { %v382_v49 = vpop.f32.mrf.mxu2 }
 0x152   :  { %v383_v50 = vadd.f32 %v1115_v47, %v382_v49 }
 0x154   :  { %v386_v52 = vmax.f32 %v383_v50, 0.0  ;;  %v1007_v50 = vld [vmem:[#allocation10 + $0x30] sm:$0xf] }
 0x156   :  { %v387_v53 = vpack.c.bf16 %v386_v52, %v385_v51  ;;  %v1094_v51 = vld [vmem:[#allocation10 + $0x34] sm:$0xf0]  ;;  %v1093_v52 = vld [vmem:[#allocation10 + $0x34] sm:$0xf] }
 0x158   :  { %946 = vmatmul.msk.bf16.vlgmr.msra.gmra.mxu3 %vm424_vm0, %v387_v53  ;;  %v1008_v53 = vor.u32 %v1094_v51, %v1007_v50 }
 0x15a   :  { %681 = vmatpush.bf16.msrb.mxu1 %v1008_v53 }
 0x1db   :  { %v437_v56 = vpop.f32.mrf.mxu3 }
 0x1dc   :  { %v438_v57 = vadd.f32 %v1116_v55, %v437_v56  ;;  %v999_v56 = vld [vmem:[#allocation10 + $0x20] sm:$0xf] }
 0x1de   :  { %785 = vst [vmem:[#allocation12] sm:$0xff] %v438_v57  ;;  %v444_v58 = vmul.f32 0.5, %v438_v57 }
 0x1e0   :  { %v446_v59 = vmul.f32 1.442695, %v444_v58  ;;  %v1091_v58 = vld [vmem:[#allocation10 + $0x24] sm:$0xf] }
 0x1e2   :  { %1119 = vpow2.f32 %v446_v59 }
 0x1e3   :  { %v439_v60 = vpop.f32.mrf.mxu3 }
 0x1e4   :  { %v440_v61 = vadd.f32 %v1116_v55, %v439_v60  ;;  %v1012_v55 = vor.u32 %v1093_v52, %v1009_v54  ;;  %v1001_v60 = vld [vmem:[#allocation10 + $0x28] sm:$0xf0] }
 0x1e6   :  { %v445_v62 = vmul.f32 0.5, %v440_v61  ;;  %786 = vst [vmem:[#allocation12 + $0x8] sm:$0xff] %v440_v61  ;;  %695 = vmatpush.bf16.msrb.mxu2 %v1012_v55 }
 0x1e7   :  { %812 = dma.vmem_to_hbm [thread:$0]  %s805_s18, 256, %s807_s21, [#allocation13], %s1318_s26, %s1318_s26, %s1319_s27  }
 0x1e8   :  { %v1120_v63 = vpop.eup %1119  ;;  %v448_v0 = vmul.f32 1.442695, %v445_v62  ;;  %v991_v62 = vld [vmem:[#allocation10 + $0x10] sm:$0xf] }
 0x1e9   :  { %452 = vrot.lane.b32.xlu0 %v1120_v63, %s1323_s23  ;;  %v1090_v63 = vld [vmem:[#allocation10 + $0x14] sm:$0xf0] }
 0x1ea   :  { %1121 = vpow2.f32 %v448_v0  ;;  %v1089_v0 = vld [vmem:[#allocation10 + $0x14] sm:$0xf] }
 0x1eb   :  { %v996_v3 = vor.u32 %v1089_v0, %v993_v2 }
 0x1f0   :  { %v1122_v1 = vpop.eup %1121 }
 0x1f1   :  { %454 = vrot.lane.b32.xlu0 %v1122_v1, %s1323_s23  ;;  %v992_v1 = vor.u32 %v1090_v63, %v991_v62 }
 0x25b   :  { %v453_v6 = vpop.permute.xlu0 %452 }
 0x25c   :  { %v458_v9 = vmul.f32 %v453_v6, %v442_v7  ;;  %v1087_v6 = vld [vmem:[#allocation10 + $0x4] sm:$0xf]  ;;  %v984_v7 = vor.u32 %v1088_v5, %v983_v4 }
 0x25e   :  { %v460_v12 = vadd.f32 %v458_v9, %v438_v57  ;;  %v1092_v57 = vld [vmem:[#allocation10 + $0x24] sm:$0xf0] }
 0x25f   :  { %v1000_v59 = vor.u32 %v1092_v57, %v999_v56 }
 0x261   :  { %682 = vmatpush.bf16.msrb.mxu1 %v1000_v59 }
 0x263   :  { %v455_v10 = vpop.permute.xlu0 %454 }
 0x264   :  { %v459_v11 = vmul.f32 %v455_v10, %v443_v8  ;;  %v985_v8 = vld [vmem:[#allocation10 + $0x8] sm:$0xf0] }
 0x265   :  { %683 = vmatpush.bf16.msrb.mxu1 %v992_v1  ;;  %v988_v9 = vor.u32 %v1087_v6, %v985_v8 }
 0x266   :  { %v461_v13 = vadd.f32 %v459_v11, %v440_v61  ;;  %v1004_v61 = vor.u32 %v1091_v58, %v1001_v60  ;;  %v1118_v11 = vld [vmem:[%s1537_s11] ss:$0 sm:$0xff] }
 0x268   :  { %v462_v14 = vpack.c.bf16 %v461_v13, %v460_v12  ;;  %696 = vmatpush.bf16.msrb.mxu2 %v1004_v61 }
 0x269   :  { %684 = vmatpush.bf16.msrb.mxu1 %v984_v7 }
 0x26a   :  { %963 = vmatmul.msk.bf16.vlgmr.msrb.gmra.mxu3 %vm424_vm0, %v462_v14 }
 0x26c   :  { %697 = vmatpush.bf16.msrb.mxu2 %v996_v3 }
 0x270   :  { %698 = vmatpush.bf16.msrb.mxu2 %v988_v9 }
 0x2ed   :  { %v511_v42 = vpop.f32.mrf.mxu3 }
 0x2ee   :  { %v512_v44 = vadd.f32 %v1117_v43, %v511_v42 }
 0x2f0   :  { %v516_v47 = vmax.f32 %v512_v44, 0.0 }
 0x2f5   :  { %v513_v45 = vpop.f32.mrf.mxu3 }
 0x2f6   :  { %v514_v46 = vadd.f32 %v1117_v43, %v513_v45 }
 0x2f8   :  { %v517_v48 = vmax.f32 %v514_v46, 0.0 }
 0x2fa   :  { %v518_v49 = vpack.c.bf16 %v517_v48, %v516_v47 }
 0x2fc   :  { %980 = vmatmul.msk.bf16.vlgmr.msrb.gmra.mxu0 %vm424_vm0, %v518_v49 }
 0x379   :  { %v567_v10 = vpop.f32.mrf.mxu0 }
 0x37a   :  { %v568_v12 = vadd.f32 %v1118_v11, %v567_v10 }
 0x37c   :  { %v572_v15 = vmax.f32 %v568_v12, 0.0 }
 0x381   :  { %v569_v13 = vpop.f32.mrf.mxu0 }
 0x382   :  { %v570_v14 = vadd.f32 %v1118_v11, %v569_v13 }
 0x384   :  { %v573_v16 = vmax.f32 %v570_v14, 0.0 }
 0x386   :  { %v574_v17 = vpack.c.bf16 %v573_v16, %v572_v15 }
 0x388   :  { %685 = vmatmul.bf16.vlgmr.msrb.gmra.mxu1 %v574_v17  ;;  %699 = vmatmul.bf16.vlgmr.msrb.gmra.mxu2 %v574_v17 }
 0x405   :  { %v686_v20 = vpop.f32.mrf.mxu1 }
 0x406   :  { %v687_v21 = vadd.f32 %v686_v20, %v593_v19 }
 0x408   :  { %v1045_v22 = vmul.f32 -1.442695, %v687_v21 }
 0x40a   :  { %1123 = vpow2.f32 %v1045_v22 }
 0x40b   :  { %v700_v24 = vpop.f32.mrf.mxu2 }
 0x40c   :  { %v701_v25 = vadd.f32 %v700_v24, %v594_v23 }
 0x40d   :  { %v688_v26 = vpop.f32.mrf.mxu1 }
 0x40e   :  { %v1046_v27 = vmul.f32 -1.442695, %v701_v25  ;;  %v689_v28 = vadd.f32 %v688_v26, %v593_v19 }
 0x410   :  { %v1124_v29 = vpop.eup %1123  ;;  %1125 = vpow2.f32 %v1046_v27  ;;  %v1047_v30 = vmul.f32 -1.442695, %v689_v28 }
 0x411   :  { %v717_v31 = vadd.f32 1.0, %v1124_v29 }
 0x412   :  { %1127 = vpow2.f32 %v1047_v30 }
 0x413   :  { %1129 = vrcp.f32 %v717_v31  ;;  %v702_v32 = vpop.f32.mrf.mxu2  ;;  %vm726_vm2 = vweird.f32 %v717_v31  ;;  %v730_v51 = vand.u32 2147483647, %v717_v31  ;;  %v732_v52 = vand.u32 2147483648, %v717_v31 }
 0x414   :  { %v703_v33 = vadd.f32 %v702_v32, %v594_v23 }
 0x415   :  { %v733_v61 = vor.u32 1.1754944e-38, %v732_v52  ;;  %vm731_vm7 = vcmp.eq.f32.partialorder %v730_v51, 8.507059e+37 }
 0x416   :  { %v1126_v34 = vpop.eup %1125  ;;  %v1048_v35 = vmul.f32 -1.442695, %v703_v33 }
 0x417   :  { %v718_v36 = vadd.f32 1.0, %v1126_v34 }
 0x418   :  { %v1128_v37 = vpop.eup %1127  ;;  %1131 = vpow2.f32 %v1048_v35 }
 0x419   :  { %v1130_v38 = vpop.eup %1129  ;;  %1133 = vrcp.f32 %v718_v36  ;;  %v719_v39 = vadd.f32 1.0, %v1128_v37  ;;  %v747_v53 = vand.u32 2147483648, %v718_v36  ;;  %v745_v56 = vand.u32 2147483647, %v718_v36 }
 0x41a   :  { %v722_v40 = vmul.f32 %v1130_v38, %v717_v31  ;;  %vm727_vm1 = vweird.f32 %v1130_v38  ;;  %vm741_vm5 = vweird.f32 %v718_v36 }
 0x41b   :  { %1135 = vrcp.f32 %v719_v39  ;;  %vm728_vm4 = vmor %vm726_vm2, %vm727_vm1  ;;  %v748_v62 = vor.u32 1.1754944e-38, %v747_v53  ;;  %vm746_vm8 = vcmp.eq.f32.partialorder %v745_v56, 8.507059e+37  ;;  %vm756_vm10 = vweird.f32 %v719_v39 }
 0x41c   :  { %v723_v41 = vsub.f32 1.0, %v722_v40  ;;  %v762_v6 = vand.u32 2147483648, %v719_v39  ;;  %v760_v8 = vand.u32 2147483647, %v719_v39 }
 0x41e   :  { %v1132_v42 = vpop.eup %1131  ;;  %v724_v43 = vmul.f32 %v1130_v38, %v723_v41  ;;  %v763_v13 = vor.u32 1.1754944e-38, %v762_v6  ;;  %vm761_vm15 = vcmp.eq.f32.partialorder %v760_v8, 8.507059e+37 }
 0x41f   :  { %v1134_v44 = vpop.eup %1133  ;;  %v720_v45 = vadd.f32 1.0, %v1132_v42 }
 0x420   :  { %v737_v46 = vmul.f32 %v1134_v44, %v718_v36  ;;  %v725_v50 = vadd.f32 %v1130_v38, %v724_v43  ;;  %vm742_vm3 = vweird.f32 %v1134_v44 }
 0x421   :  { %v1136_v47 = vpop.eup %1135  ;;  %1137 = vrcp.f32 %v720_v45  ;;  %vm743_vm6 = vmor %vm741_vm5, %vm742_vm3  ;;  %v777_v7 = vand.u32 2147483648, %v720_v45  ;;  %v775_v10 = vand.u32 2147483647, %v720_v45  ;;  %vm771_vm13 = vweird.f32 %v720_v45 }
 0x422   :  { %v738_v48 = vsub.f32 1.0, %v737_v46  ;;  %v752_v49 = vmul.f32 %v1136_v47, %v719_v39  ;;  %v729_v57 = vsel %vm728_vm4, %v1130_v38, %v725_v50  ;;  %vm757_vm9 = vweird.f32 %v1136_v47 }
 0x423   :  { %v734_v1 = vsel %vm731_vm7, %v733_v61, %v729_v57  ;;  %vm758_vm12 = vmor %vm756_vm10, %vm757_vm9  ;;  %v778_v14 = vor.u32 1.1754944e-38, %v777_v7  ;;  %vm776_vm0 = vcmp.eq.f32.partialorder %v775_v10, 8.507059e+37 }
 0x424   :  { %v753_v54 = vsub.f32 1.0, %v752_v49  ;;  %v739_v55 = vmul.f32 %v1134_v44, %v738_v48 }
 0x426   :  { %v740_v58 = vadd.f32 %v1134_v44, %v739_v55  ;;  %v754_v59 = vmul.f32 %v1136_v47, %v753_v54 }
 0x427   :  { %v1138_v60 = vpop.eup %1137 }
 0x428   :  { %v767_v63 = vmul.f32 %v1138_v60, %v720_v45  ;;  %v744_v0 = vsel %vm743_vm6, %v1134_v44, %v740_v58  ;;  %v755_v4 = vadd.f32 %v1136_v47, %v754_v59  ;;  %vm772_vm11 = vweird.f32 %v1138_v60 }
 0x429   :  { %v749_v2 = vsel %vm746_vm8, %v748_v62, %v744_v0  ;;  %vm773_vm14 = vmor %vm771_vm13, %vm772_vm11 }
 0x42a   :  { %v768_v3 = vsub.f32 1.0, %v767_v63  ;;  %v781_v5 = vpack.c.bf16 %v749_v2, %v734_v1  ;;  %v759_v11 = vsel %vm758_vm12, %v1136_v47, %v755_v4 }
 0x42b   :  { %v764_v16 = vsel %vm761_vm15, %v763_v13, %v759_v11 }
 0x42c   :  { %v769_v9 = vmul.f32 %v1138_v60, %v768_v3  ;;  %783 = vst [vmem:[#allocation11] sm:$0xff] %v781_v5 }
 0x42e   :  { %v770_v12 = vadd.f32 %v1138_v60, %v769_v9 }
 0x430   :  { %v774_v15 = vsel %vm773_vm14, %v1138_v60, %v770_v12 }
 0x431   :  { %v779_v17 = vsel %vm776_vm0, %v778_v14, %v774_v15 }
 0x432   :  { %v782_v18 = vpack.c.bf16 %v779_v17, %v764_v16 }
 0x434   :  { %784 = vst [vmem:[#allocation11 + $0x8] sm:$0xff] %v782_v18 }
 0x435   :  { %799 = dma.vmem_to_hbm [thread:$0]  %s792_s15, 256, %s794_s7, [#allocation4], %s1318_s26, %s1318_s26, %s1319_s27  }
 0x436   :  { %1313 = dma.done.wait [#allocation4], 256  }
 0x437   :  { %1314 = vsyncadd [#allocation4], 4294967040 }
 0x438   :  { %1315 = dma.done.wait [#allocation13], 256  }
 0x439   :  { %1316 = vsyncadd [#allocation13], 4294967040 }
 0x43a   :  { %821 = vsyncpa [#allocation3], 1 }
 0x43b   :  { %822 = vsyncpa [#allocation6], 1 }
 0x43c   :  { %823 = vsyncpa [#allocation9], 1 }
 0x43d   :  { %824 = vsyncpa [#allocation4], 1 }
 0x43e   :  { %825 = vsyncpa [#allocation13], 1 }

</bundles_post_ra>
